<compile_context>
chip_gen: v7x
topology: tpu7x:2x2x1
jax: 0.10.0
libtpu: 0.0.40
codegen_flags: <defaults>
</compile_context>

<pallas_src>
import functools

import jax
import jax.numpy as jnp
from jax.experimental import pallas as pl
from jax.experimental.pallas import tpu as pltpu


# -----------------------------------------------------------------------------
# Fused Pallas kernel: learner forward + LDA scatter matrices, one task / step
# -----------------------------------------------------------------------------
def _fused_kernel(x_ref, adj_ref, oh_ref, p_ref, out_ref, *,
                  n, j, f, hg, hm, e, c):
    x = x_ref[0]          # (N*J, F)    flattened in the wrapper
    adj = adj_ref[0]      # (N*J, N*J)  block-diagonal, built in the wrapper
    oh = oh_ref[0]        # (N, C)      one-hot labels
    p = p_ref[0]          # (P, W)      packed parameters

    # ---- unpack parameters (static slices of the single packed buffer) ------
    r = 0
    wg = p[r:r + f, 0:hg]; r += f                 # (F, Hg)
    wm = p[r:r + hg, 0:hm]; r += hg               # (Hg, Hm)
    wo = p[r:r + hm, 0:e]; r += hm                # (Hm, E)
    bg = p[r:r + 1, 0:hg]                         # (1, Hg)
    bm = p[r + 1:r + 2, 0:hm]                     # (1, Hm)
    bo = p[r + 2:r + 3, 0:e]                      # (1, E)

    # ---- learner -------------------------------------------------------------
    # GCN layer as two full-size matmuls: one flat (N*J,F)@(F,Hg) push and one
    # block-diagonal (N*J,N*J)@(N*J,Hg) push (replaces N tiny per-sample pushes)
    xw = jnp.dot(x, wg, preferred_element_type=jnp.float32)             # (N*J, Hg)
    h1 = jnp.dot(adj, xw, preferred_element_type=jnp.float32) + bg
    h1 = jnp.maximum(h1, 0.0)
    pooled = jnp.sum(h1.reshape(n, j, hg), axis=1) * (1.0 / j)          # (N, Hg)
    h2 = jnp.maximum(
        jnp.dot(pooled, wm, preferred_element_type=jnp.float32) + bm, 0.0)
    emb = jnp.dot(h2, wo, preferred_element_type=jnp.float32) + bo      # (N, E)

    # ---- LDA scatter matrices ------------------------------------------------
    # One-hot contractions stay on the VPU (C is tiny): per-class masked sums
    # with exact counts -> class means -> per-sample assigned class mean.
    assigned = jnp.zeros((n, e), jnp.float32)
    for cls in range(c):
        wcol = oh[:, cls:cls + 1]                                        # (N, 1)
        cnt = jnp.sum(wcol)                                              # scalar (exact)
        mean_c = jnp.sum(wcol * emb, axis=0, keepdims=True) / cnt        # (1, E)
        assigned = assigned + wcol * mean_c

    overall = jnp.sum(emb, axis=0, keepdims=True) * (1.0 / n)            # (1, E)
    centered = emb - assigned                                            # (N, E)
    bdiff = assigned - overall                                           # (N, E)

    # Fused S_w / S_b: a single (N,2E)^T @ (N,2E) contraction.  The diagonal
    # E x E blocks of the (2E,2E) Gram matrix are S_w (ridge added) and S_b;
    # the off-diagonal blocks are discarded by the wrapper (negligible FLOPs).
    cat = jnp.concatenate([centered, bdiff], axis=1)                     # (N, 2E)
    dn = (((0,), (0,)), ((), ()))                                        # contract samples
    big = jax.lax.dot_general(cat, cat, dn,
                              preferred_element_type=jnp.float32)        # (2E, 2E)
    row = jax.lax.broadcasted_iota(jnp.int32, (2 * e, 2 * e), 0)
    col = jax.lax.broadcasted_iota(jnp.int32, (2 * e, 2 * e), 1)
    ridge = jnp.where((row == col) & (row < e),
                      jnp.float32(1e-4), jnp.float32(0.0))
    out_ref[0] = big + ridge                                             # one writeback DMA


def _fused_pallas(params_b, x, adj, oh):
    """params_b: tuple of per-task params (leading dim T). Returns (sw, sb), (T,E,E)."""
    wg, bg, wm, bm, wo, bo = params_b
    t, n, j, f = x.shape
    hg, hm, e = wg.shape[-1], wm.shape[-1], wo.shape[-1]
    c = oh.shape[-1]
    w = max(hg, hm, e)

    # Wrapper-side layout plumbing (cheap XLA ops, outside the kernel):
    #   flat node axis for x; block-diagonal adjacency; one packed param buffer.
    x_flat = x.reshape(t, n * j, f)
    adj_bd = jnp.einsum('tnij,nm->tnimj', adj,
                        jnp.eye(n, dtype=adj.dtype)).reshape(t, n * j, n * j)

    def _padw(a):
        return jnp.pad(a, ((0, 0), (0, 0), (0, w - a.shape[-1])))
    packed = jnp.concatenate(
        [_padw(wg), _padw(wm), _padw(wo), _padw(bg), _padw(bm), _padw(bo)],
        axis=1)                                                   # (T, F+Hg+Hm+3, W)
    pad_rows = (-packed.shape[1]) % 8
    if pad_rows:
        packed = jnp.pad(packed, ((0, 0), (0, pad_rows), (0, 0)))
    p_rows = packed.shape[1]

    flops = t * (2 * n * j * f * hg + 2 * (n * j) ** 2 * hg
                 + 2 * n * hg * hm + 2 * n * hm * e + 2 * n * (2 * e) ** 2)
    bytes_in = sum(int(a.size) * a.dtype.itemsize
                   for a in (x_flat, adj_bd, oh, packed))
    bytes_out = t * (2 * e) * (2 * e) * 4
    cost = pl.CostEstimate(flops=flops, transcendentals=0,
                           bytes_accessed=bytes_in + bytes_out)

    kernel = functools.partial(_fused_kernel, n=n, j=j, f=f,
                               hg=hg, hm=hm, e=e, c=c)

    out = pl.pallas_call(
        kernel,
        out_shape=jax.ShapeDtypeStruct((t, 2 * e, 2 * e), jnp.float32),
        grid=(t,),
        in_specs=[
            pl.BlockSpec((1, n * j, f), lambda i: (i, 0, 0)),        # x (flat)
            pl.BlockSpec((1, n * j, n * j), lambda i: (i, 0, 0)),    # adj (block-diag)
            pl.BlockSpec((1, n, c), lambda i: (i, 0, 0)),            # one-hot labels
            pl.BlockSpec((1, p_rows, w), lambda i: (i, 0, 0)),       # packed params
        ],
        out_specs=pl.BlockSpec((1, 2 * e, 2 * e), lambda i: (i, 0, 0)),
        compiler_params=pltpu.CompilerParams(
            dimension_semantics=("parallel",)),                      # v7x: 2 TCs
        cost_estimate=cost,
    )(x_flat, adj_bd, oh, packed)

    sw = out[:, :e, :e]
    sb = out[:, e:, e:]
    return sw, sb


def _fused_ref(params_b, x, adj, oh):
    # Pure-JAX reference, mathematically identical to the Pallas kernel; used
    # only for the custom-VJP backward pass (first-order MAML -> no need to
    # differentiate through the Pallas call itself).
    wg, bg, wm, bm, wo, bo = params_b
    e = wo.shape[-1]
    xw = jnp.einsum('tnjf,tfh->tnjh', x, wg,
                    preferred_element_type=jnp.float32)
    h1 = jnp.maximum(jnp.einsum('tnij,tnjh->tnih', adj, xw,
                                preferred_element_type=jnp.float32)
                     + bg[:, None], 0.0)
    pooled = jnp.mean(h1, axis=2)
    h2 = jnp.maximum(jnp.einsum('tnh,thm->tnm', pooled, wm,
                                preferred_element_type=jnp.float32) + bm, 0.0)
    emb = jnp.einsum('tnm,tme->tne', h2, wo,
                     preferred_element_type=jnp.float32) + bo          # (T,N,E)
    counts = jnp.sum(oh, axis=1, keepdims=True)                        # (T,1,C)
    class_sums = jnp.einsum('tnc,tne->tce', oh, emb)
    class_means = class_sums / jnp.swapaxes(counts, 1, 2)              # (T,C,E)
    assigned = jnp.einsum('tnc,tce->tne', oh, class_means)
    centered = emb - assigned
    sw = jnp.einsum('tne,tnf->tef', centered, centered) \
        + 1e-4 * jnp.eye(e, dtype=jnp.float32)
    overall = jnp.mean(emb, axis=1, keepdims=True)
    bdiff = assigned - overall
    sb = jnp.einsum('tne,tnf->tef', bdiff, bdiff)
    return sw, sb


@jax.custom_vjp
def fused_scatter(params_b, x, adj, oh):
    return _fused_pallas(params_b, x, adj, oh)


def _fused_fwd(params_b, x, adj, oh):
    return _fused_pallas(params_b, x, adj, oh), (params_b, x, adj, oh)


def _fused_bwd(res, g):
    params_b, x, adj, oh = res
    _, vjp = jax.vjp(_fused_ref, params_b, x, adj, oh)
    return vjp(g)


fused_scatter.defvjp(_fused_fwd, _fused_bwd)


def batched_lda_loss(params_b, x, adj, oh):
    """Per-task LDA losses, shape (T,). Matches the PyTorch lda_loss
    (assumes >= 2 classes, all classes present in every batch)."""
    sw, sb = fused_scatter(params_b, x, adj, oh)
    e = sw.shape[-1]
    eye = jnp.eye(e, dtype=sw.dtype)
    # TODO(synk): torch.linalg.solve try/except fallback has no traced-JAX
    #             equivalent (no exceptions); the NaN/Inf guard covers it.
    # Probe solve under stop_gradient to detect singular / NaN tasks, then
    # re-solve with a safe (identity, zero) system so the VJP through
    # jnp.linalg.solve cannot emit NaN gradients for masked tasks.
    probe = jnp.linalg.solve(jax.lax.stop_gradient(sw),
                             jax.lax.stop_gradient(sb))
    raw = -jnp.trace(probe, axis1=-2, axis2=-1)
    bad = jnp.isnan(raw) | jnp.isinf(raw)
    sw_safe = jnp.where(bad[:, None, None], eye, sw)
    sb_safe = jnp.where(bad[:, None, None], jnp.zeros_like(sb), sb)
    loss = -jnp.trace(jnp.linalg.solve(sw_safe, sb_safe), axis1=-2, axis2=-1)
    return jnp.where(bad, 0.0, loss)


# -----------------------------------------------------------------------------
# Adam (PyTorch defaults) and Meta.forward
# -----------------------------------------------------------------------------
def adam_init(params):
    zeros = jax.tree_util.tree_map(jnp.zeros_like, params)
    return (zeros, jax.tree_util.tree_map(jnp.zeros_like, params), jnp.int32(0))


def adam_step(params, grads, state, lr, b1=0.9, b2=0.999, eps=1e-8):
    m, v, t = state
    t = t + 1
    tf = t.astype(jnp.float32)
    m = jax.tree_util.tree_map(lambda m_, g: b1 * m_ + (1.0 - b1) * g, m, grads)
    v = jax.tree_util.tree_map(lambda v_, g: b2 * v_ + (1.0 - b2) * g * g, v, grads)
    bc1 = 1.0 - b1 ** tf
    bc2 = 1.0 - b2 ** tf
    new_params = jax.tree_util.tree_map(
        lambda p, m_, v_: p - lr * (m_ / bc1) / (jnp.sqrt(v_ / bc2) + eps),
        params, m, v)
    return new_params, (m, v, t)


def make_meta_forward(update_lr, meta_lr, update_step, n_way, task_num):

    def total_loss(params_b, x, adj, oh):
        return jnp.sum(batched_lda_loss(params_b, x, adj, oh))

    loss_and_grad = jax.value_and_grad(total_loss)
    tmap = jax.tree_util.tree_map

    @jax.jit
    def meta_forward(params, adam_state, x_spt, y_spt, adj_spt,
                     x_qry, y_qry, adj_qry):
        oh_spt = jax.nn.one_hot(y_spt, n_way, dtype=jnp.float32)   # (T,N,C)
        oh_qry = jax.nn.one_hot(y_qry, n_way, dtype=jnp.float32)

        # Broadcast shared params to per-task copies (fast weights diverge).
        params_b = tmap(lambda p: jnp.broadcast_to(p[None], (task_num,) + p.shape),
                        params)

        losses_q = [jnp.float32(0.0) for _ in range(update_step + 1)]

        # Note: the two evaluation-only learner forwards of the PyTorch code
        # (outputs discarded) are intentionally dropped.

        # Inner step 0 on support, all tasks batched in one pallas_call
        # (grads detached in torch -> first-order MAML).
        _, g0 = loss_and_grad(params_b, x_spt, adj_spt, oh_spt)
        fast = tmap(lambda p, g: p - update_lr * g, params_b, g0)

        losses_q[1] = losses_q[1] + total_loss(fast, x_qry, adj_qry, oh_qry)

        meta_grad = None
        for k in range(1, update_step):
            _, gk = loss_and_grad(fast, x_spt, adj_spt, oh_spt)
            fast = tmap(lambda p, g: p - update_lr * g, fast, gk)
            loss_qk, gq = loss_and_grad(fast, x_qry, adj_qry, oh_qry)
            losses_q[k + 1] = losses_q[k + 1] + loss_qk
            if k == update_step - 1:
                # d(loss_q_final)/d(theta) == d(loss_q)/d(fast) (first order)
                meta_grad = tmap(lambda g: jnp.sum(g, axis=0) / task_num, gq)

        if meta_grad is None:
            meta_grad = tmap(jnp.zeros_like, params)

        loss_q_final = losses_q[update_step] / task_num
        new_params, new_state = adam_step(params, meta_grad, adam_state, meta_lr)

        # `corrects` is never incremented in the reference -> accuracies are 0.
        dummy_accs = jnp.zeros((update_step + 1,), jnp.float32)
        return dummy_accs, loss_q_final, new_params, new_state

    return meta_forward


# -----------------------------------------------------------------------------
# Main
# -----------------------------------------------------------------------------
if __name__ == "__main__":
    # hyper-parameters (args)
    task_num, n_way, k_spt, k_qry = 2, 2, 2, 2
    update_step = 2
    update_lr, meta_lr = 1e-3, 1e-3

    # learner_args
    J, F, Hg, Hm, E = 8, 16, 32, 32, 16       # joints, feat, gcn_hid, mlp_hid, emb
    setsz_spt = n_way * k_spt
    setsz_qry = n_way * k_qry

    key = jax.random.PRNGKey(0)
    ks = jax.random.split(key, 8)

    # deterministic parameter init (weights ~ 0.1*N(0,1), biases zero as (1,H))
    params = (
        0.1 * jax.random.normal(ks[0], (F, Hg), jnp.float32),
        jnp.zeros((1, Hg), jnp.float32),
        0.1 * jax.random.normal(ks[1], (Hg, Hm), jnp.float32),
        jnp.zeros((1, Hm), jnp.float32),
        0.1 * jax.random.normal(ks[2], (Hm, E), jnp.float32),
        jnp.zeros((1, E), jnp.float32),
    )
    adam_state = adam_init(params)

    x_spt = jax.random.normal(ks[3], (task_num, setsz_spt, J, F), jnp.float32)
    adj_spt = jax.random.uniform(ks[4], (task_num, setsz_spt, J, J), jnp.float32)
    x_qry = jax.random.normal(ks[5], (task_num, setsz_qry, J, F), jnp.float32)
    adj_qry = jax.random.uniform(ks[6], (task_num, setsz_qry, J, J), jnp.float32)
    y_spt = jnp.tile(jnp.repeat(jnp.arange(n_way, dtype=jnp.int32), k_spt)[None],
                     (task_num, 1))
    y_qry = jnp.tile(jnp.repeat(jnp.arange(n_way, dtype=jnp.int32), k_qry)[None],
                     (task_num, 1))

    meta_forward = make_meta_forward(update_lr, meta_lr, update_step, n_way,
                                     task_num)

    accs, loss_q_final, new_params, new_state = meta_forward(
        params, adam_state, x_spt, y_spt, adj_spt, x_qry, y_qry, adj_qry)

    jax.block_until_ready((accs, loss_q_final, new_params))
    print("KERNEL_OK")
</pallas_src>

<mosaic_0001>
module attributes {stable_mosaic.version = 11 : i64} {
  func.func @_fused_kernel(%arg0: i32, %arg1: memref<1x32x16xf32, #tpu.memory_space<vmem>>, %arg2: memref<1x32x32xf32, #tpu.memory_space<vmem>>, %arg3: memref<1x4x2xf32, #tpu.memory_space<vmem>>, %arg4: memref<1x88x32xf32, #tpu.memory_space<vmem>>, %arg5: memref<1x32x32xf32, #tpu.memory_space<vmem>>) attributes {dimension_semantics = [#tpu.dimension_semantics<parallel>], iteration_bounds = array<i64: 2>, scalar_prefetch = 0 : i64, scratch_operands = 0 : i64, tpu.core_type = #tpu.core_type<tc>, window_params = [{transform_indices = @transform_0, window_bounds = array<i64: 1, 32, 16>}, {transform_indices = @transform_1, window_bounds = array<i64: 1, 32, 32>}, {transform_indices = @transform_2, window_bounds = array<i64: 1, 4, 2>}, {transform_indices = @transform_3, window_bounds = array<i64: 1, 88, 32>}, {transform_indices = @transform_4, window_bounds = array<i64: 1, 32, 32>}]} {
    %c0 = arith.constant 0 : index
    %c0_0 = arith.constant 0 : index
    %c0_1 = arith.constant 0 : index
    %0 = vector.load %arg1[%c0, %c0_0, %c0_1] : memref<1x32x16xf32, #tpu.memory_space<vmem>>, vector<1x32x16xf32>
    %1 = vector.shape_cast %0 : vector<1x32x16xf32> to vector<32x16xf32>
    %c0_2 = arith.constant 0 : index
    %c0_3 = arith.constant 0 : index
    %c0_4 = arith.constant 0 : index
    %2 = vector.load %arg2[%c0_2, %c0_3, %c0_4] : memref<1x32x32xf32, #tpu.memory_space<vmem>>, vector<1x32x32xf32>
    %3 = vector.shape_cast %2 : vector<1x32x32xf32> to vector<32x32xf32>
    %c0_5 = arith.constant 0 : index
    %c0_6 = arith.constant 0 : index
    %c0_7 = arith.constant 0 : index
    %4 = vector.load %arg3[%c0_5, %c0_6, %c0_7] : memref<1x4x2xf32, #tpu.memory_space<vmem>>, vector<1x4x2xf32>
    %5 = vector.shape_cast %4 : vector<1x4x2xf32> to vector<4x2xf32>
    %c0_8 = arith.constant 0 : index
    %c0_9 = arith.constant 0 : index
    %c0_10 = arith.constant 0 : index
    %6 = vector.load %arg4[%c0_8, %c0_9, %c0_10] : memref<1x88x32xf32, #tpu.memory_space<vmem>>, vector<1x88x32xf32>
    %7 = vector.shape_cast %6 : vector<1x88x32xf32> to vector<88x32xf32>
    %8 = vector.extract_strided_slice %7 {offsets = [0, 0], sizes = [16, 32], strides = [1, 1]} : vector<88x32xf32> to vector<16x32xf32>
    %9 = vector.extract_strided_slice %7 {offsets = [16, 0], sizes = [32, 32], strides = [1, 1]} : vector<88x32xf32> to vector<32x32xf32>
    %10 = vector.extract_strided_slice %7 {offsets = [48, 0], sizes = [32, 16], strides = [1, 1]} : vector<88x32xf32> to vector<32x16xf32>
    %11 = vector.extract_strided_slice %7 {offsets = [80, 0], sizes = [1, 32], strides = [1, 1]} : vector<88x32xf32> to vector<1x32xf32>
    %12 = vector.extract_strided_slice %7 {offsets = [81, 0], sizes = [1, 32], strides = [1, 1]} : vector<88x32xf32> to vector<1x32xf32>
    %13 = vector.extract_strided_slice %7 {offsets = [82, 0], sizes = [1, 16], strides = [1, 1]} : vector<88x32xf32> to vector<1x16xf32>
    %cst = arith.constant dense<0.000000e+00> : vector<32x32xf32>
    %14 = tpu.matmul %1, %8, %cst {dimension_numbers = #tpu.dot_dimension_numbers<[1], [0], [0], [1], [0, 0, 1, 1], [], []>} : vector<32x16xf32>, vector<16x32xf32>, vector<32x32xf32> -> vector<32x32xf32>
    %cst_11 = arith.constant dense<0.000000e+00> : vector<32x32xf32>
    %15 = tpu.matmul %3, %14, %cst_11 {dimension_numbers = #tpu.dot_dimension_numbers<[1], [0], [0], [1], [0, 0, 1, 1], [], []>} : vector<32x32xf32>, vector<32x32xf32>, vector<32x32xf32> -> vector<32x32xf32>
    %16 = vector.broadcast %11 : vector<1x32xf32> to vector<32x32xf32>
    %17 = arith.addf %15, %16 : vector<32x32xf32>
    %cst_12 = arith.constant 0.000000e+00 : f32
    %18 = vector.broadcast %cst_12 : f32 to vector<32x32xf32>
    %19 = arith.maximumf %17, %18 : vector<32x32xf32>
    %20 = vector.shape_cast %19 : vector<32x32xf32> to vector<4x8x32xf32>
    %cst_13 = arith.constant dense<0.000000e+00> : vector<4x32xf32>
    %21 = vector.multi_reduction <add>, %20, %cst_13 [1] : vector<4x8x32xf32> to vector<4x32xf32>
    %cst_14 = arith.constant 1.250000e-01 : f32
    %22 = vector.broadcast %cst_14 : f32 to vector<4x32xf32>
    %23 = arith.mulf %21, %22 : vector<4x32xf32>
    %cst_15 = arith.constant dense<0.000000e+00> : vector<4x32xf32>
    %24 = tpu.matmul %23, %9, %cst_15 {dimension_numbers = #tpu.dot_dimension_numbers<[1], [0], [0], [1], [0, 0, 1, 1], [], []>} : vector<4x32xf32>, vector<32x32xf32>, vector<4x32xf32> -> vector<4x32xf32>
    %25 = vector.broadcast %12 : vector<1x32xf32> to vector<4x32xf32>
    %26 = arith.addf %24, %25 : vector<4x32xf32>
    %cst_16 = arith.constant 0.000000e+00 : f32
    %27 = vector.broadcast %cst_16 : f32 to vector<4x32xf32>
    %28 = arith.maximumf %26, %27 : vector<4x32xf32>
    %cst_17 = arith.constant dense<0.000000e+00> : vector<4x16xf32>
    %29 = tpu.matmul %28, %10, %cst_17 {dimension_numbers = #tpu.dot_dimension_numbers<[1], [0], [0], [1], [0, 0, 1, 1], [], []>} : vector<4x32xf32>, vector<32x16xf32>, vector<4x16xf32> -> vector<4x16xf32>
    %30 = vector.broadcast %13 : vector<1x16xf32> to vector<4x16xf32>
    %31 = arith.addf %29, %30 : vector<4x16xf32>
    %cst_18 = arith.constant 0.000000e+00 : f32
    %32 = vector.broadcast %cst_18 : f32 to vector<4x16xf32>
    %33 = vector.extract_strided_slice %5 {offsets = [0, 0], sizes = [4, 1], strides = [1, 1]} : vector<4x2xf32> to vector<4x1xf32>
    %34 = vector.shape_cast %33 : vector<4x1xf32> to vector<1x4x1xf32>
    %cst_19 = arith.constant dense<0.000000e+00> : vector<1xf32>
    %35 = vector.multi_reduction <add>, %34, %cst_19 [1, 2] : vector<1x4x1xf32> to vector<1xf32>
    %36 = vector.shape_cast %35 : vector<1xf32> to vector<1x1x1xf32>
    %37 = vector.extract %36[0, 0, 0] : f32 from vector<1x1x1xf32>
    %38 = vector.broadcast %33 : vector<4x1xf32> to vector<4x16xf32>
    %39 = arith.mulf %38, %31 : vector<4x16xf32>
    %cst_20 = arith.constant dense<0.000000e+00> : vector<16xf32>
    %40 = vector.multi_reduction <add>, %39, %cst_20 [0] : vector<4x16xf32> to vector<16xf32>
    %41 = vector.shape_cast %40 : vector<16xf32> to vector<1x16xf32>
    %42 = vector.broadcast %37 : f32 to vector<1x16xf32>
    %43 = arith.divf %41, %42 : vector<1x16xf32>
    %44 = vector.broadcast %33 : vector<4x1xf32> to vector<4x16xf32>
    %45 = vector.broadcast %43 : vector<1x16xf32> to vector<4x16xf32>
    %46 = arith.mulf %44, %45 : vector<4x16xf32>
    %47 = arith.addf %32, %46 : vector<4x16xf32>
    %48 = vector.extract_strided_slice %5 {offsets = [0, 1], sizes = [4, 1], strides = [1, 1]} : vector<4x2xf32> to vector<4x1xf32>
    %49 = vector.shape_cast %48 : vector<4x1xf32> to vector<1x4x1xf32>
    %cst_21 = arith.constant dense<0.000000e+00> : vector<1xf32>
    %50 = vector.multi_reduction <add>, %49, %cst_21 [1, 2] : vector<1x4x1xf32> to vector<1xf32>
    %51 = vector.shape_cast %50 : vector<1xf32> to vector<1x1x1xf32>
    %52 = vector.extract %51[0, 0, 0] : f32 from vector<1x1x1xf32>
    %53 = vector.broadcast %48 : vector<4x1xf32> to vector<4x16xf32>
    %54 = arith.mulf %53, %31 : vector<4x16xf32>
    %cst_22 = arith.constant dense<0.000000e+00> : vector<16xf32>
    %55 = vector.multi_reduction <add>, %54, %cst_22 [0] : vector<4x16xf32> to vector<16xf32>
    %56 = vector.shape_cast %55 : vector<16xf32> to vector<1x16xf32>
    %57 = vector.broadcast %52 : f32 to vector<1x16xf32>
    %58 = arith.divf %56, %57 : vector<1x16xf32>
    %59 = vector.broadcast %48 : vector<4x1xf32> to vector<4x16xf32>
    %60 = vector.broadcast %58 : vector<1x16xf32> to vector<4x16xf32>
    %61 = arith.mulf %59, %60 : vector<4x16xf32>
    %62 = arith.addf %47, %61 : vector<4x16xf32>
    %cst_23 = arith.constant dense<0.000000e+00> : vector<16xf32>
    %63 = vector.multi_reduction <add>, %31, %cst_23 [0] : vector<4x16xf32> to vector<16xf32>
    %64 = vector.shape_cast %63 : vector<16xf32> to vector<1x16xf32>
    %cst_24 = arith.constant 2.500000e-01 : f32
    %65 = vector.broadcast %cst_24 : f32 to vector<1x16xf32>
    %66 = arith.mulf %64, %65 : vector<1x16xf32>
    %67 = arith.subf %31, %62 : vector<4x16xf32>
    %68 = vector.broadcast %66 : vector<1x16xf32> to vector<4x16xf32>
    %69 = arith.subf %62, %68 : vector<4x16xf32>
    %70 = tpu.concatenate %67, %69 in 1 : vector<4x16xf32>, vector<4x16xf32> -> vector<4x32xf32>
    %cst_25 = arith.constant dense<0.000000e+00> : vector<32x32xf32>
    %71 = tpu.matmul %70, %70, %cst_25 {dimension_numbers = #tpu.dot_dimension_numbers<[0], [0], [1], [1], [0, 1, 1, 1], [], []>} : vector<4x32xf32>, vector<4x32xf32>, vector<32x32xf32> -> vector<32x32xf32>
    %72 = tpu.iota {dimensions = array<i32: 0>} : vector<32x32xi32>
    %73 = tpu.iota {dimensions = array<i32: 1>} : vector<32x32xi32>
    %74 = arith.cmpi eq, %72, %73 : vector<32x32xi32>
    %c16_i32 = arith.constant 16 : i32
    %75 = vector.broadcast %c16_i32 : i32 to vector<32x32xi32>
    %76 = arith.cmpi slt, %72, %75 : vector<32x32xi32>
    %77 = arith.andi %74, %76 : vector<32x32xi1>
    %cst_26 = arith.constant 9.99999974E-5 : f32
    %cst_27 = arith.constant 0.000000e+00 : f32
    %78 = vector.broadcast %cst_26 : f32 to vector<32x32xf32>
    %79 = vector.broadcast %cst_27 : f32 to vector<32x32xf32>
    %80 = arith.select %77, %78, %79 : vector<32x32xi1>, vector<32x32xf32>
    %81 = arith.addf %71, %80 : vector<32x32xf32>
    %c0_28 = arith.constant 0 : index
    %c0_29 = arith.constant 0 : index
    %c0_30 = arith.constant 0 : index
    %82 = vector.load %arg5[%c0_28, %c0_29, %c0_30] : memref<1x32x32xf32, #tpu.memory_space<vmem>>, vector<1x32x32xf32>
    %83 = vector.shape_cast %82 : vector<1x32x32xf32> to vector<32x32xf32>
    %84 = vector.shape_cast %81 : vector<32x32xf32> to vector<1x32x32xf32>
    tpu.vector_store %arg5[%c0_28, %c0_29, %c0_30], %84 {strides = array<i32>} : memref<1x32x32xf32, #tpu.memory_space<vmem>>, vector<1x32x32xf32>,
    return
  }
  func.func @transform_0(%arg0: i32) -> (i32, i32, i32) {
    %c0_i32 = arith.constant 0 : i32
    %c0_i32_0 = arith.constant 0 : i32
    %c0_i32_1 = arith.constant 0 : i32
    return %arg0, %c0_i32, %c0_i32_0 : i32, i32, i32
  }
  func.func @transform_1(%arg0: i32) -> (i32, i32, i32) {
    %c0_i32 = arith.constant 0 : i32
    %c0_i32_0 = arith.constant 0 : i32
    %c0_i32_1 = arith.constant 0 : i32
    return %arg0, %c0_i32, %c0_i32_0 : i32, i32, i32
  }
  func.func @transform_2(%arg0: i32) -> (i32, i32, i32) {
    %c0_i32 = arith.constant 0 : i32
    %c0_i32_0 = arith.constant 0 : i32
    %c0_i32_1 = arith.constant 0 : i32
    return %arg0, %c0_i32, %c0_i32_0 : i32, i32, i32
  }
  func.func @transform_3(%arg0: i32) -> (i32, i32, i32) {
    %c0_i32 = arith.constant 0 : i32
    %c0_i32_0 = arith.constant 0 : i32
    %c0_i32_1 = arith.constant 0 : i32
    return %arg0, %c0_i32, %c0_i32_0 : i32, i32, i32
  }
  func.func @transform_4(%arg0: i32) -> (i32, i32, i32) {
    %c0_i32 = arith.constant 0 : i32
    %c0_i32_0 = arith.constant 0 : i32
    %c0_i32_1 = arith.constant 0 : i32
    return %arg0, %c0_i32, %c0_i32_0 : i32, i32, i32
  }
}

</mosaic_0001>

<bundles_post_ra>
// kernel: custom-call.60
= control target key start
LH: loop header
LB: loop body
LE: loop exit
PB: predicated region body
PF: predicated region fallthrough
CT: control target
= control target key end

     0   :  { %5 = vsyncpa [#allocation4], 0  ;;  %s963_s0 = inlined_call_operand.vmem [shape: f32[2,16,16], index: 0, kind: input, shape index: {}]   ;;  %s964_s1 = inlined_call_operand.vmem [shape: f32[2,16,16], index: 1, kind: output, shape index: {0}]   ;;  %s965_s2 = inlined_call_operand.hbm [shape: s32[2,16], index: 2, kind: output, shape index: {1}]   ;;  %s966_s3 = inlined_call_operand.vmem [shape: s32[2,16], index: 3, kind: output, shape index: {2}]  }
   0x1   :  { %7 = vsyncpa [#allocation4 + $0x1], 0  ;;  %s755_s12 = smov 0   ;;  %s757_s13 = smov 0  }
   0x2   :  { %s759_s14 = smov 0   ;;  %s761_s15 = smov 0  }
   0x3 LB: > { %s776_s16 = sadd.s32 4294967295, %s723_s15   ;;  %s565_s17 = sadd.s32 4294967294, %s723_s15   ;;  %s723_s15 = sphi %s761_s15, %s974_s15   ;;  %s719_s14 = sphi %s759_s14, %s973_s14   ;;  %s715_s13 = sphi %s757_s13, %s972_s13   ;;  %s711_s12 = sphi %s755_s12, %s971_s12  }
   0x4   : > { %s780_s18 = sadd.s32 1, %s723_s15   ;;  %s17_s19 = sshrl.u32 %s723_s15, 3 }
   0x5   : > { %s18_s20 = sshrl.u32 %s780_s18, 3  ;;  %s22_s21 = sadd.s32 1, %s719_s14 }
   0x6   : > { %s19_s22 = ssub.s32 %s17_s19, %s18_s20  ;;  %p32_p0 = scmp.ne.s32.totalorder %s719_s14, %s715_s13 }
   0x7   : > { %p20_p1 = scmp.eq.s32.totalorder %s19_s22, 0  ;;  %p33_p2 = scmp.eq.s32.totalorder %s776_s16, 1 }
   0x8   : > { %p38_p3 = scmp.ne.s32.totalorder %s715_s13, %s711_s12  ;;  %p39_p4 = scmp.eq.s32.totalorder %s565_s17, 1 }
   0x9   : > { %s791_s23 = scalar_select %p20_p1, %s719_s14, %s22_s21  }
   0xa   : > { %p793_p5 = por %p33_p2, %p32_p0  ;;  %p797_p6 = por %p39_p4, %p38_p3 }
   0xb   : > { %p567_p7 = scmp.ge.s32.totalorder %s723_s15, 2 }
   0xc   : > { %s85_s26 = sand.u32 (!%p567_p7), 1, %s723_s15   ;;  %s569_s27 = sshll.u32 (!%p567_p7), %s723_s15, 4 }
   0xd   : > { %83 = sbr.rel (%p567_p7) target bundleno = 20 (0x14), region = 16  ;;  %s568_s28 = sshll.u32 (!%p567_p7), %s85_s26, 4 }
   0xe   : > { %s89_s4 = scalar_lea.vmem (!%p567_p7), %s963_s0, %s569_s27  ;;  %s87_s5 = scalar_lea.vmem (!%p567_p7), [#allocation0], %s568_s28 }
   0xf   : > { %v102_v0 = vld [vmem:[%s89_s4] sm:$0xff] (!%p567_p7)  ;;  %v104_v1 = vld [vmem:[%s89_s4 + $0x8] sm:$0xff] (!%p567_p7) }
  0x10   : > { %103 = vst [vmem:[%s87_s5] sm:$0xff] (!%p567_p7), %v102_v0  ;;  %105 = vst [vmem:[%s87_s5 + $0x8] sm:$0xff] (!%p567_p7), %v104_v1 }
  0x14 PF: > { %p570_p8 = scmp.ge.s32.totalorder %s723_s15, 1  ;;  %p110_p9 = scmp.lt.s32.totalorder %s723_s15, 3 }
  0x16   : > { %p111_p10 = pnand %p570_p8, %p110_p9 }
  0x18   : > { %114 = sbr.rel (%p111_p10) target bundleno = 450 (0x1c2), region = 39 }
  0x1f   : > { %s117_s6 = sand.u32 1, %s776_s16   ;;  %s132_s7 = sand.u32 1, %s715_s13   ;;  %v154_v2 = vlaneseq  ;;  %v733_v6 = vmov 0  }
  0x20   : > { %s571_s8 = sshll.u32 %s117_s6, 4  ;;  %s815_s9 = sshll.u32 %s132_s7, 1 }
  0x21   : > { %v818_v3 = vshrl.u32 %v154_v2, 7  ;;  %s119_s10 = scalar_lea.vmem [#allocation0], %s571_s8  ;;  %s820_s11 = scalar_lea.vmem [#allocation1], %s571_s8 }
  0x22   : > { %v143_v4 = vld [vmem:[%s119_s10] sm:$0xff]  ;;  %v575_v5 = vld [vmem:[%s119_s10 + $0x8] sm:$0xff]  ;;  %s149_s17 = sand.u32 7, %s776_s16   ;;  %s134_s20 = scalar_lea.vmem [#allocation3], %s815_s9 }
  0x23   : > { %144 = vst [vmem:[%s820_s11] sm:$0xff] %v143_v4  ;;  %576 = vst [vmem:[%s820_s11 + $0x8] sm:$0xff] %v575_v5  ;;  %s825_s19 = scalar_lea.vmem [#allocation2], %s149_s17  ;;  %s140_s21 = scalar_lea.vmem [#allocation6], %s815_s9 }
  0x24   : > { %153 = vst [vmem:[%s825_s19] sm:$0x1] %v733_v6  ;;  %s830_s22 = scalar_lea.vmem [#allocation5], %s149_s17  ;;  %s725_s26 = smov 0  }
  0x25 LB: >> { %s577_s27 = sshll.u32 %s727_s26, 3  ;;  %s162_s26 = sadd.s32 1, %s727_s26   ;;  %s727_s26 = sphi %s725_s26, %s162_s26  }
  0x26   : >> { %v166_v7 = vstv %s577_s27  ;;  %s164_s28 = scalar_lea.vmem [#allocation7], %s577_s27  ;;  %p159_p11 = scmp.ge.s32.totalorder %s162_s26, 2  }
  0x27   : >> { %v167_v8 = vadd.s32 %v166_v7, %v818_v3  ;;  %s833_s29 = smov (%p159_p11), 0  }
  0x28   : > { %161 = sbr.rel (!%p159_p11) target bundleno = 37 (0x25), region = 191 }
  0x29   : >> { %168 = vst [vmem:[%s164_s28] sm:$0xff] %v167_v8 }
  0x2f LB: >> { %v179_v9 = vld [vmem:[%s820_s11] sm:$0xff]  ;;  %v580_v10 = vld [vmem:[%s820_s11 + $0x8] sm:$0xff]  ;;  %v841_v11 = vadd.s32 8, %v818_v3  ;;  %v844_v13 = vstv %s731_s29  ;;  %s237_s30 = ssub.s32 128, %s731_s29  ;;  %v243_v46 = vand.u32 127, %v154_v2  ;;  %s249_s4 = scalar_lea.vmem %s820_s11, %s731_s29 [#allocation1]  ;;  %s731_s29 = sphi %s833_s29, %s174_s29  }
  0x30   : >> { %v180_v12 = vand.u32 2147483647, %v179_v9  ;;  %v192_v14 = vand.u32 2147483647, %v580_v10  ;;  %vm183_vm0 = vcmp.ge.s32.totalorder %v818_v3, %v844_v13  ;;  %v246_v49 = vld [vmem:[%s825_s19] ss:$0 sm:$0xff] }
  0x31   : >> { %vm195_vm3 = vcmp.ge.s32.totalorder %v841_v11, %v844_v13  ;;  %vm267_vm13 = vcmp.gt.s32.totalorder %v243_v46, %v844_v13  ;;  %vm290_vm14 = vcmp.gt.s32.totalorder %v841_v11, %v844_v13  ;;  %vm244_vm15 = vcmp.eq.s32.totalorder %v243_v46, %v844_v13  ;;  %v251_v50 = vld [vmem:[%s249_s4] ss:$0 sm:$0xff]  ;;  %s255_s6 = scalar_lea.vmem [#allocation7], %s731_s29  ;;  %s174_s29 = sadd.s32 1, %s731_s29  }
  0x32   : >> { %vm579_vm1 = vcmp.gt.f32.partialorder %v180_v12, -inf  ;;  %v257_v51 = vld [vmem:[%s255_s6] ss:$0 sm:$0xff]  ;;  %p171_p12 = scmp.ge.s32.totalorder %s174_s29, 16  }
  0x33   : >> { %vm187_vm2 = vmand %vm183_vm0, %vm579_vm1  ;;  %s400_s17 = sshrl.u32 (%p171_p12), %s776_s16, 3  ;;  %s586_s26 = sshll.u32 (%p171_p12), %s776_s16, 4 }
  0x34   : >> { %v188_v15 = vsel %vm187_vm2, %v818_v3, %v844_v13  ;;  %v189_v16 = vsel %vm187_vm2, %v180_v12, -inf  ;;  %vm864_vm0 = vmand %vm290_vm14, %vm244_vm15  ;;  %vm275_vm2 = vcmp.gt.s32.totalorder %v818_v3, %v844_v13  ;;  %s587_s27 = sshll.u32 (%p171_p12), %s400_s17, 5  ;;  %s377_s29 = scalar_lea.vmem (%p171_p12), %s964_s1, %s586_s26 }
  0x35   : >> { %vm198_vm4 = vcmp.lt.f32.partialorder %v189_v16, %v192_v14  ;;  %s734_s26 = smov (%p171_p12), [#allocation3]  }
  0x36   : >> { %vm199_vm5 = vmand %vm195_vm3, %vm198_vm4 }
  0x37   : >> { %v200_v17 = vsel %vm199_vm5, %v841_v11, %v188_v15  ;;  %v201_v18 = vsel %vm199_vm5, %v192_v14, %v189_v16  ;;  %vm279_vm4 = vmand %vm275_vm2, %vm244_vm15 }
  0x38   : >> { %v202_v19 = vrot.slane %v201_v18, 1  ;;  %v203_v20 = vrot.slane %v200_v17, 1 }
  0x3a   : >> { %vm204_vm6 = vcmp.ge.f32.partialorder %v202_v19, %v201_v18  ;;  %v207_v21 = vrot.slane %v202_v19, 1  ;;  %v208_v22 = vrot.slane %v203_v20, 1 }
  0x3b   : >> { %v205_v23 = vsel %vm204_vm6, %v202_v19, %v201_v18  ;;  %v206_v24 = vsel %vm204_vm6, %v203_v20, %v200_v17 }
  0x3c   : >> { %vm209_vm7 = vcmp.ge.f32.partialorder %v207_v21, %v205_v23  ;;  %v212_v25 = vrot.slane %v207_v21, 1  ;;  %v213_v26 = vrot.slane %v208_v22, 1 }
  0x3d   : >> { %v210_v27 = vsel %vm209_vm7, %v207_v21, %v205_v23  ;;  %v211_v28 = vsel %vm209_vm7, %v208_v22, %v206_v24 }
  0x3e   : >> { %vm214_vm8 = vcmp.ge.f32.partialorder %v212_v25, %v210_v27  ;;  %v217_v29 = vrot.slane %v212_v25, 1  ;;  %v218_v30 = vrot.slane %v213_v26, 1 }
  0x3f   : >> { %v215_v31 = vsel %vm214_vm8, %v212_v25, %v210_v27  ;;  %v216_v32 = vsel %vm214_vm8, %v213_v26, %v211_v28 }
  0x40   : >> { %vm219_vm9 = vcmp.ge.f32.partialorder %v217_v29, %v215_v31  ;;  %v222_v33 = vrot.slane %v217_v29, 1  ;;  %v223_v34 = vrot.slane %v218_v30, 1 }
  0x41   : >> { %v220_v35 = vsel %vm219_vm9, %v217_v29, %v215_v31  ;;  %v221_v36 = vsel %vm219_vm9, %v218_v30, %v216_v32 }
  0x42   : >> { %vm224_vm10 = vcmp.ge.f32.partialorder %v222_v33, %v220_v35  ;;  %v227_v37 = vrot.slane %v222_v33, 1  ;;  %v228_v38 = vrot.slane %v223_v34, 1 }
  0x43   : >> { %v225_v39 = vsel %vm224_vm10, %v222_v33, %v220_v35  ;;  %v226_v40 = vsel %vm224_vm10, %v223_v34, %v221_v36 }
  0x44   : >> { %vm229_vm11 = vcmp.ge.f32.partialorder %v227_v37, %v225_v39  ;;  %v232_v41 = vrot.slane %v227_v37, 1  ;;  %v233_v42 = vrot.slane %v228_v38, 1 }
  0x45   : >> { %v230_v43 = vsel %vm229_vm11, %v227_v37, %v225_v39  ;;  %v231_v44 = vsel %vm229_vm11, %v228_v38, %v226_v40 }
  0x46   : >> { %vm234_vm12 = vcmp.ge.f32.partialorder %v232_v41, %v230_v43 }
  0x47   : >> { %v236_v45 = vsel %vm234_vm12, %v233_v42, %v231_v44 }
  0x48   : >> { %238 = vrot.lane.b32.xlu0 %v236_v45, %s237_s30 }
  0xba   : >> { %v239_v48 = vpop.permute.xlu0 %238 }
  0xbb   : >> { %591 = vpush %v239_v48 }
  0xec   : >> { %s592_s5 = spop %591 }
  0xed   : >> { %v245_v52 = vstv %s592_s5  ;;  %s250_s8 = scalar_lea.vmem %s820_s11, %s592_s5 [#allocation1]  ;;  %s256_s10 = scalar_lea.vmem [#allocation7], %s592_s5 }
  0xee   : >> { %v247_v53 = vsel %vm244_vm15, %v245_v52, %v246_v49  ;;  %v252_v54 = vld [vmem:[%s250_s8] ss:$0 sm:$0xff]  ;;  %s910_s5 = scalar_lea.hbm (%p171_p12), %s965_s2, %s587_s27 }
  0xef   : >> { %v258_v55 = vld [vmem:[%s256_s10] ss:$0 sm:$0xff]  ;;  %248 = vst [vmem:[%s825_s19] sm:$0x1] %v247_v53  ;;  %253 = vst [vmem:[%s250_s8] sm:$0x1] %v251_v50  ;;  %vm261_vm1 = vcmp.ne.f32.partialorder %v252_v54, 0.0  ;;  %v268_v5 = vsel %vm267_vm13, %v252_v54, 0.0 }
  0xf0   : >> { %259 = vst [vmem:[%s256_s10] sm:$0x1] %v257_v51  ;;  %254 = vst [vmem:[%s249_s4] sm:$0x1] %v252_v54  ;;  %s368_s8 = scalar_lea.sflag (%p171_p12), [#allocation4], %s132_s7  ;;  %s657_s19 = sshll.u32 (%p171_p12), %s734_s26, 4  ;;  %s658_s19 = int_to_ptr.vmem [resolvable:$false] %s657_s19 }
  0xf1   : >> { %260 = vst [vmem:[%s255_s6] sm:$0x1] %v258_v55  ;;  %vm262_vm3 = vmand %vm244_vm15, %vm261_vm1  ;;  %s407_s6 = sshll.u32 (%p171_p12), %s134_s20, 4  ;;  %s408_s6 = int_to_ptr.vmem [resolvable:$true] %s407_s6 }
  0xf2   : >> { %v263_v56 = vsel %vm262_vm3, %v252_v54, 1.0  ;;  %s653_s10 = scalar_lea.vmem (%p171_p12), %s408_s6, 32  ;;  %p660_p2 = scmp.lt.s32.totalorder (%p171_p12), %s408_s6, %s658_s19 }
  0xf3   : >> { %v291_v57 = vsel %vm290_vm14, %v263_v56, 1.0  ;;  %v276_v58 = vsel %vm275_vm2, %v263_v56, 1.0  ;;  %p654_p13 = scmp.ne.s32.totalorder (%p171_p12), %s408_s6, %s653_s10 }
  0xf4   : >> { %649 = vrcp.f32 %v291_v57 }
  0xf5   : >> { %651 = vrcp.f32 %v276_v58  ;;  %p655_p0 = pnand (%p171_p12), %p654_p13, %p793_p5 }
  0xf6   : > { %v354_v14 = vld [vmem:[#allocation2] sm:$0x3] (%p171_p12) }
  0xf7   : >> { %v581_v60 = vld [vmem:[%s820_s11 + $0x8] sm:$0xff]  ;;  %v272_v63 = vld [vmem:[%s820_s11] sm:$0xff]  ;;  %356 = vst [vmem:[%s134_s20] sm:$0x3] (%p171_p12), %v354_v14  ;;  %p656_p1 = pneg (%p171_p12), %p655_p0 }
  0xf8   : > { %v301_v12 = vld [vmem:[#allocation7] sm:$0xff] (%p171_p12)  ;;  %v303_v13 = vld [vmem:[#allocation7 + $0x8] sm:$0xff] (%p171_p12) }
  0xfe   : >> { %v650_v59 = vpop.eup %649 }
  0xff   : >> { %v652_v61 = vpop.eup %651  ;;  %v293_v62 = vmul.f32 %v650_v59, %v581_v60 }
 0x100   : >> { %v278_v0 = vmul.f32 %v652_v61, %v272_v63 }
 0x101   : >> { %v295_v1 = vsel %vm864_vm0, %v293_v62, 0.0 }
 0x102   : >> { %296 = vadd.xlane.f32.xlu1 %v295_v1  ;;  %v280_v4 = vsel %vm279_vm4, %v278_v0, 0.0 }
 0x103   : >> { %281 = vadd.xlane.f32.xlu0 %v280_v4 }
 0x130   : > { %318 = vxpose.xlu0.b32.start [1/2] (short) (narrow) (%p171_p12), %v301_v12, 8 }
 0x134   : > { %319 = vxpose.xlu0.b32.end [2/2] (short) (narrow) (%p171_p12), %v303_v13, 8 }
 0x18f   : >> { %v297_v6 = vpop.xlane.xlu1 %296  ;;  %173 = sbr.rel (!%p171_p12) target bundleno = 47 (0x2f), region = 202 }
 0x190   : >> { %v298_v7 = vmul.f32 %v297_v6, %v268_v5  ;;  %v282_v8 = vpop.xlane.xlu0 %281 }
 0x191   : >> { %v283_v9 = vmul.f32 %v282_v8, %v268_v5 }
 0x192   : >> { %v299_v10 = vsub.f32 %v293_v62, %v298_v7 }
 0x193   : >> { %v284_v11 = vsub.f32 %v278_v0, %v283_v9 }
 0x194   : >> { %582 = vst [vmem:[%s820_s11 + $0x8] sm:$0xff] %v299_v10 }
 0x195   : >> { %285 = vst [vmem:[%s820_s11] sm:$0xff] %v284_v11 }
 0x19b   : > { %v392_v3 = vld [vmem:[%s820_s11 + $0x8] sm:$0xff] }
 0x19c   : > { %v390_v2 = vld [vmem:[%s820_s11] sm:$0xff]  ;;  %393 = vst [vmem:[%s377_s29 + $0x8] sm:$0xff] %v392_v3  ;;  %s659_s11 = scalar_lea.vmem %s658_s19, 64 }
 0x19d   : > { %391 = vst [vmem:[%s377_s29] sm:$0xff] %v390_v2  ;;  %p661_p3 = scmp.lt.s32.totalorder %s659_s11, %s653_s10 }
 0x19f   : > { %p662_p4 = por %p661_p3, %p660_p2 }
 0x1a1   : > { %p663_p8 = pnand %p662_p4, %p656_p1 }
 0x1a3   : > { %666 = shalt.err (!%p663_p8)
}
 0x1a4   : > { %s667_s7 = scalar_lea.hbm %s910_s5, 32  ;;  %s671_s28 = scalar_lea.hbm %s965_s2, 32 }
 0x1a5   : > { %p668_p9 = scmp.ne.s32.totalorder %s910_s5, %s667_s7  ;;  %p672_p12 = scmp.lt.u32.totalorder %s910_s5, %s965_s2 }
 0x1a6   : > { %p673_p13 = scmp.lt.u32.totalorder %s671_s28, %s667_s7  ;;  %p675_p1 = scmp.lt.u32.totalorder %s667_s7, %s910_s5 }
 0x1a7   : > { %p669_p10 = pnand %p668_p9, %p793_p5 }
 0x1a8   : > { %p674_p0 = por %p673_p13, %p672_p12 }
 0x1a9   : > { %p670_p11 = pneg %p669_p10 }
 0x1aa   : > { %p676_p2 = por %p675_p1, %p674_p0 }
 0x1ac   : > { %p677_p3 = pnand %p676_p2, %p670_p11 }
 0x1ae   : > { %680 = shalt.err (!%p677_p3)
}
 0x1af   : > { %593 = dma.vmem_to_hbm [thread:$0]  (%p793_p5), %s408_s6, 32, %s910_s5, %s368_s8  }
 0x1b0   : > { %v334_v15 = vpop.trf.xlu0  ;;  %s588_s4 = sshll.u32 (%p793_p5), %s400_s17, 1 }
 0x1b1   : > { %350 = vst [vmem:[%s830_s22] sm:$0x1] %v334_v15  ;;  %s416_s19 = scalar_lea.vmem (%p793_p5), %s966_s3, %s588_s4 }
 0x1b3   : > { %413 = sbr.rel (!%p793_p5) target bundleno = 450 (0x1c2), region = 80 }
 0x1b8   : > { %v360_v16 = vld [vmem:[#allocation5] sm:$0x3] }
 0x1b9   : > { %362 = vst [vmem:[%s140_s21] sm:$0x3] %v360_v16 }
 0x1c0   : > { %v432_v17 = vld [vmem:[%s140_s21] sm:$0x3] }
 0x1c1   : > { %433 = vst [vmem:[%s416_s19] sm:$0x3] %v432_v17 }
 0x1c2 PF: > { %s460_s22 = sand.u32 1, %s711_s12   ;;  %p596_p5 = pnand %p567_p7, %p797_p6 }
 0x1c3   : > { %s461_s24 = scalar_lea.sflag [#allocation4], %s460_s22 }
 0x1c4   : > { %706 = dma.done.wait (!%p596_p5), %s461_s24, 32  }
 0x1c5   : > { %708 = vsyncadd (!%p596_p5), %s461_s24, 4294967264  ;;  %p10_p4 = scmp.ge.s32.totalorder %s780_s18, 4   ;;  %s971_s12 = smov %s715_s13 }
 0x1c6   : > { %s972_s13 = smov %s719_s14  ;;  %s973_s14 = smov %s791_s23 }
 0x1c7   : > { %s974_s15 = smov %s780_s18  ;;  %12 = sbr.rel (!%p10_p4) target bundleno = 3 (0x3), region = 213 }
 0x1ce   :  { %473 = vsyncpa [#allocation4], 1 }
 0x1cf   :  { %475 = vsyncpa [#allocation4 + $0x1], 1 }

// kernel: custom-call.63
= control target key start
LH: loop header
LB: loop body
LE: loop exit
PB: predicated region body
PF: predicated region fallthrough
CT: control target
= control target key end

     0   :  { %s552_s6 = smov 0   ;;  %s554_s7 = smov 0   ;;  %s641_s0 = inlined_call_operand.vmem [shape: f32[2,1,16,16], index: 0, kind: input, shape index: {}]   ;;  %s642_s1 = inlined_call_operand.vmem [shape: f32[2,1,16,16], index: 1, kind: output, shape index: {}]  }
   0x1   :  { %s556_s8 = smov 0  }
   0x2 LB: > { %s468_s9 = sadd.s32 4294967295, %s538_s8   ;;  %s33_s10 = sadd.s32 1, %s534_s7  ;;  %s538_s8 = sphi %s556_s8, %s7_s8   ;;  %s534_s7 = sphi %s554_s7, %s644_s7   ;;  %s530_s6 = sphi %s552_s6, %s643_s6  }
   0x3   : > { %p35_p0 = scmp.ge.s32.totalorder %s33_s10, 2  ;;  %p470_p1 = scmp.ge.s32.totalorder %s538_s8, 2 }
   0x4   : > { %s49_s11 = sand.u32 (!%p470_p1), 1, %s538_s8   ;;  %s484_s12 = sshll.u32 (!%p470_p1), %s534_s7, 4 }
   0x5   : > { %s646_s10 = smov (%p35_p0, %s33_s10), 0  ;;  %47 = sbr.rel (%p470_p1) target bundleno = 12 (0xc), region = 16 }
   0x6   : > { %s471_s13 = sshll.u32 (!%p470_p1), %s49_s11, 4  ;;  %s58_s16 = scalar_lea.vmem (!%p470_p1), %s641_s0, %s484_s12 }
   0x7   : > { %v88_v0 = vld [vmem:[%s58_s16] sm:$0xff] (!%p470_p1)  ;;  %v90_v1 = vld [vmem:[%s58_s16 + $0x8] sm:$0xff] (!%p470_p1)  ;;  %s51_s17 = scalar_lea.vmem (!%p470_p1), [#allocation0], %s471_s13 }
   0x8   : > { %89 = vst [vmem:[%s51_s17] sm:$0xff] (!%p470_p1), %v88_v0  ;;  %91 = vst [vmem:[%s51_s17 + $0x8] sm:$0xff] (!%p470_p1), %v90_v1 }
   0xc PF: > { %p474_p2 = scmp.ge.s32.totalorder %s538_s8, 1  ;;  %p96_p3 = scmp.lt.s32.totalorder %s538_s8, 3 }
   0xe   : > { %p97_p4 = pnand %p474_p2, %p96_p3 }
  0x10   : > { %100 = sbr.rel (%p97_p4) target bundleno = 2373 (0x945), region = 54 }
  0x17   : > { %s103_s18 = sand.u32 1, %s468_s9   ;;  %v114_v2 = vlaneseq  ;;  %v540_v11 = vmov -1.0   ;;  %v541_v55 = vmov 0.0   ;;  %s485_s21 = sshll.u32 %s530_s6, 4 }
  0x18   : > { %s475_s19 = sshll.u32 %s103_s18, 4  ;;  %s368_s24 = scalar_lea.vmem %s642_s1, %s485_s21 }
  0x19   : > { %v579_v3 = vand.u32 127, %v114_v2  ;;  %v118_v4 = vshrl.u32 %v114_v2, 7  ;;  %s581_s20 = scalar_lea.vmem [#allocation0], %s475_s19 }
  0x1a   : > { %v121_v5 = vld [vmem:[%s581_s20] sm:$0xff]  ;;  %v477_v38 = vld [vmem:[%s581_s20 + $0x8] sm:$0xff] }
  0x1b   : > { %vm120_vm0 = vcmp.eq.s32.totalorder %v118_v4, %v579_v3  ;;  %vm116_vm1 = vcmp.lt.s32.totalorder %v579_v3, 16  ;;  %vm125_vm2 = vcmp.ge.s32.totalorder %v118_v4, %v579_v3  ;;  %vm155_vm4 = vcmp.eq.s32.totalorder %v579_v3, 0 }
  0x1c   : > { %v122_v6 = vsel %vm120_vm0, %v121_v5, 0.0  ;;  %vm126_vm3 = vmand %vm125_vm2, %vm116_vm1  ;;  %vm152_vm5 = vcmp.eq.s32.totalorder %v579_v3, %v118_v4  ;;  %v156_v12 = vsel %vm155_vm4, 1.0, %v540_v11  ;;  %vm170_vm6 = vcmp.eq.s32.totalorder %v579_v3, 1 }
  0x1d   : > { %123 = vadd.xlane.f32.xlu0 %v122_v6  ;;  %v127_v8 = vsel %vm126_vm3, %v121_v5, 0.0  ;;  %v157_v13 = vsel %vm152_vm5, %v156_v12, 0.0  ;;  %vm180_vm7 = vcmp.eq.s32.totalorder %v579_v3, 2  ;;  %vm190_vm8 = vcmp.eq.s32.totalorder %v579_v3, 3 }
  0x1e   : > { %vm200_vm9 = vcmp.eq.s32.totalorder %v579_v3, 4  ;;  %v135_v33 = vadd.s32 8, %v118_v4  ;;  %vm210_vm11 = vcmp.eq.s32.totalorder %v579_v3, 5  ;;  %vm220_vm14 = vcmp.eq.s32.totalorder %v579_v3, 6 }
  0x1f   : > { %vm230_vm0 = vcmp.eq.s32.totalorder %v579_v3, 7  ;;  %vm254_vm2 = vcmp.eq.s32.totalorder %v579_v3, 9  ;;  %vm268_vm3 = vcmp.eq.s32.totalorder %v579_v3, 10  ;;  %vm282_vm4 = vcmp.eq.s32.totalorder %v579_v3, 11 }
  0x20   : > { %vm136_vm10 = vcmp.eq.s32.totalorder %v135_v33, %v579_v3  ;;  %vm141_vm12 = vcmp.ge.s32.totalorder %v135_v33, %v579_v3  ;;  %vm163_vm15 = vcmp.eq.s32.totalorder %v579_v3, %v135_v33  ;;  %vm296_vm5 = vcmp.eq.s32.totalorder %v579_v3, 12 }
  0x21   : > { %v138_v39 = vsel %vm136_vm10, %v477_v38, 0.0  ;;  %vm142_vm13 = vmand %vm141_vm12, %vm116_vm1  ;;  %v164_v56 = vsel %vm163_vm15, -1.0, %v541_v55  ;;  %vm240_vm1 = vcmp.eq.s32.totalorder %v579_v3, 8 }
  0x22   : > { %v143_v46 = vsel %vm142_vm13, %v477_v38, 0.0 }
  0xaa   : > { %v585_v7 = vpop.xlane.xlu0 %123 }
  0xab   : > { %512 = vrcp.f32 %v585_v7  ;;  %vm349_vm10 = vweird.f32 %v585_v7 }
  0xb5   : > { %v592_v9 = vpop.eup %512 }
  0xb6   : > { %v129_v10 = vmul.f32 %v592_v9, %v127_v8 }
  0xb8   : > { %130 = vst [vmem:[#allocation2] sm:$0xff] %v129_v10 }
  0xbf   : > { %v166_v14 = vld [vmem:[#allocation2 + $0x1] ss:$0 sm:$0xff]  ;;  %v176_v17 = vld [vmem:[#allocation2 + $0x2] ss:$0 sm:$0xff]  ;;  %v186_v22 = vld [vmem:[#allocation2 + $0x3] ss:$0 sm:$0xff] }
  0xc0   : > { %v167_v15 = vxor.u32 2147483648, %v166_v14  ;;  %v177_v19 = vxor.u32 2147483648, %v176_v17  ;;  %v187_v24 = vxor.u32 2147483648, %v186_v22  ;;  %v196_v27 = vld [vmem:[#allocation2 + $0x4] ss:$0 sm:$0xff] }
  0xc1   : > { %v197_v29 = vxor.u32 2147483648, %v196_v27  ;;  %v206_v32 = vld [vmem:[#allocation2 + $0x5] ss:$0 sm:$0xff]  ;;  %v216_v40 = vld [vmem:[#allocation2 + $0x6] ss:$0 sm:$0xff] }
  0xc2   : > { %v171_v16 = vmul.f32 %v167_v15, %v157_v13  ;;  %v207_v35 = vxor.u32 2147483648, %v206_v32  ;;  %v217_v42 = vxor.u32 2147483648, %v216_v40  ;;  %v226_v49 = vld [vmem:[#allocation2 + $0x7] ss:$0 sm:$0xff] }
  0xc3   : > { %v227_v52 = vxor.u32 2147483648, %v226_v49 }
  0xc4   : > { %172 = vadd.xlane.f32.xlu0 %v171_v16 }
 0x151   : > { %v173_v18 = vpop.xlane.xlu0 %172 }
 0x152   : > { %v174_v20 = vsel %vm170_vm6, %v173_v18, %v157_v13  ;;  %vm310_vm6 = vcmp.eq.s32.totalorder %v579_v3, 13 }
 0x153   : > { %v181_v21 = vmul.f32 %v177_v19, %v174_v20 }
 0x155   : > { %182 = vadd.xlane.f32.xlu1 %v181_v21 }
 0x1e2   : > { %v183_v23 = vpop.xlane.xlu1 %182 }
 0x1e3   : > { %v184_v25 = vsel %vm180_vm7, %v183_v23, %v174_v20  ;;  %vm324_vm7 = vcmp.eq.s32.totalorder %v579_v3, 14 }
 0x1e4   : > { %v191_v26 = vmul.f32 %v187_v24, %v184_v25 }
 0x1e6   : > { %192 = vadd.xlane.f32.xlu1 %v191_v26 }
 0x273   : > { %v193_v28 = vpop.xlane.xlu1 %192 }
 0x274   : > { %v194_v30 = vsel %vm190_vm8, %v193_v28, %v184_v25  ;;  %vm338_vm8 = vcmp.eq.s32.totalorder %v579_v3, 15 }
 0x275   : > { %v201_v31 = vmul.f32 %v197_v29, %v194_v30 }
 0x277   : > { %202 = vadd.xlane.f32.xlu0 %v201_v31 }
 0x304   : > { %v203_v34 = vpop.xlane.xlu0 %202 }
 0x305   : > { %v204_v36 = vsel %vm200_vm9, %v203_v34, %v194_v30 }
 0x306   : > { %v211_v37 = vmul.f32 %v207_v35, %v204_v36 }
 0x308   : > { %212 = vadd.xlane.f32.xlu1 %v211_v37 }
 0x30c   : > { %139 = vadd.xlane.f32.xlu1 %v138_v39 }
 0x395   : > { %v213_v41 = vpop.xlane.xlu1 %212 }
 0x396   : > { %v214_v43 = vsel %vm210_vm11, %v213_v41, %v204_v36 }
 0x397   : > { %v221_v44 = vmul.f32 %v217_v42, %v214_v43 }
 0x399   : > { %222 = vadd.xlane.f32.xlu0 %v221_v44  ;;  %v604_v45 = vpop.xlane.xlu1 %139 }
 0x39a   : > { %514 = vrcp.f32 %v604_v45  ;;  %vm354_vm9 = vweird.f32 %v604_v45 }
 0x3a4   : > { %v610_v47 = vpop.eup %514 }
 0x3a5   : > { %v145_v48 = vmul.f32 %v610_v47, %v143_v46 }
 0x3a7   : > { %146 = vst [vmem:[#allocation2 + $0x8] sm:$0xff] %v145_v48 }
 0x3ae   : > { %v236_v50 = vld [vmem:[#allocation2 + $0x8] ss:$0 sm:$0xff]  ;;  %v250_v61 = vld [vmem:[#allocation2 + $0x9] ss:$0 sm:$0xff]  ;;  %v264_v6 = vld [vmem:[#allocation2 + $0xa] ss:$0 sm:$0xff] }
 0x3af   : > { %v237_v53 = vxor.u32 2147483648, %v236_v50  ;;  %v251_v0 = vxor.u32 2147483648, %v250_v61  ;;  %v265_v11 = vxor.u32 2147483648, %v264_v6  ;;  %v278_v16 = vld [vmem:[#allocation2 + $0xb] ss:$0 sm:$0xff] }
 0x3b0   : > { %v279_v19 = vxor.u32 2147483648, %v278_v16  ;;  %v292_v24 = vld [vmem:[#allocation2 + $0xc] ss:$0 sm:$0xff]  ;;  %v306_v32 = vld [vmem:[#allocation2 + $0xd] ss:$0 sm:$0xff] }
 0x3b1   : > { %v245_v58 = vmul.f32 %v237_v53, %v164_v56  ;;  %v293_v27 = vxor.u32 2147483648, %v292_v24  ;;  %v307_v35 = vxor.u32 2147483648, %v306_v32  ;;  %v320_v40 = vld [vmem:[#allocation2 + $0xe] ss:$0 sm:$0xff]  ;;  %v334_v50 = vld [vmem:[#allocation2 + $0xf] ss:$0 sm:$0xff] }
 0x426   : > { %v223_v51 = vpop.xlane.xlu0 %222 }
 0x427   : > { %v224_v54 = vsel %vm220_vm14, %v223_v51, %v214_v43  ;;  %v321_v43 = vxor.u32 2147483648, %v320_v40 }
 0x428   : > { %v231_v57 = vmul.f32 %v227_v52, %v224_v54 }
 0x42a   : > { %232 = vadd.xlane.f32.xlu0 %v231_v57 }
 0x42e   : > { %246 = vadd.xlane.f32.xlu0 %v245_v58 }
 0x4b7   : > { %v233_v59 = vpop.xlane.xlu0 %232 }
 0x4b8   : > { %v234_v60 = vsel %vm230_vm0, %v233_v59, %v224_v54 }
 0x4b9   : > { %v241_v62 = vmul.f32 %v237_v53, %v234_v60  ;;  %v335_v53 = vxor.u32 2147483648, %v334_v50 }
 0x4bb   : > { %v247_v63 = vpop.xlane.xlu0 %246  ;;  %242 = vadd.xlane.f32.xlu1 %v241_v62 }
 0x4bc   : > { %v248_v1 = vsel %vm240_vm1, %v247_v63, %v164_v56 }
 0x4bd   : > { %v259_v2 = vmul.f32 %v251_v0, %v248_v1 }
 0x4bf   : > { %260 = vadd.xlane.f32.xlu0 %v259_v2 }
 0x548   : > { %v243_v4 = vpop.xlane.xlu1 %242 }
 0x549   : > { %v244_v5 = vsel %vm240_vm1, %v243_v4, %v234_v60 }
 0x54a   : > { %v255_v8 = vmul.f32 %v251_v0, %v244_v5 }
 0x54c   : > { %v261_v10 = vpop.xlane.xlu0 %260  ;;  %256 = vadd.xlane.f32.xlu1 %v255_v8 }
 0x54d   : > { %v262_v12 = vsel %vm254_vm2, %v261_v10, %v248_v1 }
 0x54e   : > { %v273_v13 = vmul.f32 %v265_v11, %v262_v12 }
 0x550   : > { %274 = vadd.xlane.f32.xlu0 %v273_v13 }
 0x5d9   : > { %v257_v14 = vpop.xlane.xlu1 %256 }
 0x5da   : > { %v258_v15 = vsel %vm254_vm2, %v257_v14, %v244_v5 }
 0x5db   : > { %v269_v17 = vmul.f32 %v265_v11, %v258_v15 }
 0x5dd   : > { %v275_v18 = vpop.xlane.xlu0 %274  ;;  %270 = vadd.xlane.f32.xlu1 %v269_v17 }
 0x5de   : > { %v276_v20 = vsel %vm268_vm3, %v275_v18, %v262_v12 }
 0x5df   : > { %v287_v21 = vmul.f32 %v279_v19, %v276_v20 }
 0x5e1   : > { %288 = vadd.xlane.f32.xlu0 %v287_v21 }
 0x66a   : > { %v271_v22 = vpop.xlane.xlu1 %270 }
 0x66b   : > { %v272_v23 = vsel %vm268_vm3, %v271_v22, %v258_v15 }
 0x66c   : > { %v283_v25 = vmul.f32 %v279_v19, %v272_v23 }
 0x66e   : > { %v289_v26 = vpop.xlane.xlu0 %288  ;;  %284 = vadd.xlane.f32.xlu1 %v283_v25 }
 0x66f   : > { %v290_v28 = vsel %vm282_vm4, %v289_v26, %v276_v20 }
 0x670   : > { %v301_v29 = vmul.f32 %v293_v27, %v290_v28 }
 0x672   : > { %302 = vadd.xlane.f32.xlu0 %v301_v29 }
 0x6fb   : > { %v285_v30 = vpop.xlane.xlu1 %284 }
 0x6fc   : > { %v286_v31 = vsel %vm282_vm4, %v285_v30, %v272_v23 }
 0x6fd   : > { %v297_v33 = vmul.f32 %v293_v27, %v286_v31 }
 0x6ff   : > { %v303_v34 = vpop.xlane.xlu0 %302  ;;  %298 = vadd.xlane.f32.xlu1 %v297_v33 }
 0x700   : > { %v304_v36 = vsel %vm296_vm5, %v303_v34, %v290_v28 }
 0x701   : > { %v315_v37 = vmul.f32 %v307_v35, %v304_v36 }
 0x703   : > { %316 = vadd.xlane.f32.xlu0 %v315_v37 }
 0x78c   : > { %v299_v38 = vpop.xlane.xlu1 %298 }
 0x78d   : > { %v300_v39 = vsel %vm296_vm5, %v299_v38, %v286_v31 }
 0x78e   : > { %v311_v41 = vmul.f32 %v307_v35, %v300_v39 }
 0x790   : > { %v317_v42 = vpop.xlane.xlu0 %316  ;;  %312 = vadd.xlane.f32.xlu1 %v311_v41 }
 0x791   : > { %v318_v44 = vsel %vm310_vm6, %v317_v42, %v304_v36 }
 0x792   : > { %v329_v46 = vmul.f32 %v321_v43, %v318_v44 }
 0x794   : > { %330 = vadd.xlane.f32.xlu0 %v329_v46 }
 0x81d   : > { %v313_v48 = vpop.xlane.xlu1 %312 }
 0x81e   : > { %v314_v49 = vsel %vm310_vm6, %v313_v48, %v300_v39 }
 0x81f   : > { %v325_v51 = vmul.f32 %v321_v43, %v314_v49 }
 0x821   : > { %v331_v52 = vpop.xlane.xlu0 %330  ;;  %326 = vadd.xlane.f32.xlu1 %v325_v51 }
 0x822   : > { %v332_v54 = vsel %vm324_vm7, %v331_v52, %v318_v44 }
 0x823   : > { %v343_v55 = vmul.f32 %v335_v53, %v332_v54 }
 0x825   : > { %344 = vadd.xlane.f32.xlu0 %v343_v55 }
 0x8ae   : > { %v327_v56 = vpop.xlane.xlu1 %326 }
 0x8af   : > { %v328_v57 = vsel %vm324_vm7, %v327_v56, %v314_v49 }
 0x8b0   : > { %v339_v58 = vmul.f32 %v335_v53, %v328_v57 }
 0x8b2   : > { %v345_v59 = vpop.xlane.xlu0 %344  ;;  %340 = vadd.xlane.f32.xlu1 %v339_v58 }
 0x8b3   : > { %v346_v60 = vsel %vm338_vm8, %v345_v59, %v332_v54 }
 0x8b4   : > { %v353_v61 = vmul.f32 %v610_v47, %v346_v60 }
 0x8b6   : > { %v355_v62 = vsel %vm354_vm9, %v346_v60, %v353_v61 }
 0x8b7   : > { %401 = vst [vmem:[%s368_s24 + $0x8] sm:$0xff] %v355_v62 }
 0x93f   : > { %v341_v63 = vpop.xlane.xlu1 %340 }
 0x940   : > { %v342_v0 = vsel %vm338_vm8, %v341_v63, %v328_v57 }
 0x941   : > { %v348_v1 = vmul.f32 %v592_v9, %v342_v0 }
 0x943   : > { %v350_v3 = vsel %vm349_vm10, %v342_v0, %v348_v1 }
 0x944   : > { %399 = vst [vmem:[%s368_s24] sm:$0xff] %v350_v3 }
 0x945 PF: > { %s7_s8 = sadd.s32 1, %s538_s8   ;;  %s643_s6 = smov %s534_s7 }
 0x946   : > { %p4_p5 = scmp.ge.s32.totalorder %s7_s8, 4   ;;  %s644_s7 = smov %s646_s10 }
 0x948   :  { %6 = sbr.rel (!%p4_p5) target bundleno = 2 (0x2), region = 136 }

// kernel: custom-call.62
= control target key start
LH: loop header
LB: loop body
LE: loop exit
PB: predicated region body
PF: predicated region fallthrough
CT: control target
= control target key end

     0   :  { %s551_s6 = smov 0   ;;  %s553_s7 = smov 0   ;;  %s674_s0 = inlined_call_operand.vmem [shape: f32[2,1,16,16], index: 0, kind: input, shape index: {}]   ;;  %s675_s1 = inlined_call_operand.vmem [shape: f32[2,1,16,16], index: 1, kind: output, shape index: {}]  }
   0x1   :  { %s555_s8 = smov 0  }
   0x2 LB: > { %s467_s9 = sadd.s32 4294967295, %s537_s8   ;;  %s33_s10 = sadd.s32 1, %s533_s7  ;;  %s537_s8 = sphi %s555_s8, %s7_s8   ;;  %s533_s7 = sphi %s553_s7, %s677_s7   ;;  %s529_s6 = sphi %s551_s6, %s676_s6  }
   0x3   : > { %p35_p0 = scmp.ge.s32.totalorder %s33_s10, 2  ;;  %p469_p1 = scmp.ge.s32.totalorder %s537_s8, 2 }
   0x4   : > { %s49_s11 = sand.u32 (!%p469_p1), 1, %s537_s8   ;;  %s483_s12 = sshll.u32 (!%p469_p1), %s533_s7, 4 }
   0x5   : > { %s679_s10 = smov (%p35_p0, %s33_s10), 0  ;;  %47 = sbr.rel (%p469_p1) target bundleno = 12 (0xc), region = 16 }
   0x6   : > { %s470_s13 = sshll.u32 (!%p469_p1), %s49_s11, 4  ;;  %s58_s16 = scalar_lea.vmem (!%p469_p1), %s674_s0, %s483_s12 }
   0x7   : > { %v88_v0 = vld [vmem:[%s58_s16] sm:$0xff] (!%p469_p1)  ;;  %v90_v1 = vld [vmem:[%s58_s16 + $0x8] sm:$0xff] (!%p469_p1)  ;;  %s51_s17 = scalar_lea.vmem (!%p469_p1), [#allocation0], %s470_s13 }
   0x8   : > { %89 = vst [vmem:[%s51_s17] sm:$0xff] (!%p469_p1), %v88_v0  ;;  %91 = vst [vmem:[%s51_s17 + $0x8] sm:$0xff] (!%p469_p1), %v90_v1 }
   0xc PF: > { %p473_p2 = scmp.ge.s32.totalorder %s537_s8, 1  ;;  %p96_p3 = scmp.lt.s32.totalorder %s537_s8, 3 }
   0xe   : > { %p97_p4 = pnand %p473_p2, %p96_p3 }
  0x10   : > { %100 = sbr.rel (%p97_p4) target bundleno = 2375 (0x947), region = 54 }
  0x17   : > { %s103_s18 = sand.u32 1, %s467_s9   ;;  %v114_v2 = vlaneseq  ;;  %v539_v12 = vmov -1.0   ;;  %v540_v49 = vmov 0.0   ;;  %s484_s21 = sshll.u32 %s529_s6, 4 }
  0x18   : > { %s474_s19 = sshll.u32 %s103_s18, 4  ;;  %s367_s24 = scalar_lea.vmem %s675_s1, %s484_s21 }
  0x19   : > { %v578_v3 = vand.u32 127, %v114_v2  ;;  %v580_v4 = vshrl.u32 %v114_v2, 7  ;;  %s584_s20 = scalar_lea.vmem [#allocation0], %s474_s19 }
  0x1a   : > { %v476_v6 = vld [vmem:[%s584_s20 + $0x8] sm:$0xff]  ;;  %v121_v38 = vld [vmem:[%s584_s20] sm:$0xff] }
  0x1b   : > { %vm116_vm0 = vcmp.lt.s32.totalorder %v578_v3, 16  ;;  %v135_v5 = vadd.s32 8, %v580_v4  ;;  %vm162_vm4 = vcmp.eq.s32.totalorder %v578_v3, 15  ;;  %vm170_vm6 = vcmp.eq.s32.totalorder %v578_v3, 14 }
  0x1c   : > { %v163_v13 = vsel %vm162_vm4, 1.0, %v539_v12  ;;  %vm180_vm7 = vcmp.eq.s32.totalorder %v578_v3, 13  ;;  %vm190_vm8 = vcmp.eq.s32.totalorder %v578_v3, 12  ;;  %vm200_vm9 = vcmp.eq.s32.totalorder %v578_v3, 11 }
  0x1d   : > { %vm136_vm1 = vcmp.eq.s32.totalorder %v135_v5, %v578_v3  ;;  %vm141_vm2 = vcmp.le.s32.totalorder %v135_v5, %v578_v3  ;;  %vm159_vm5 = vcmp.eq.s32.totalorder %v578_v3, %v135_v5  ;;  %vm120_vm10 = vcmp.eq.s32.totalorder %v580_v4, %v578_v3 }
  0x1e   : > { %v138_v7 = vsel %vm136_vm1, %v476_v6, 0.0  ;;  %vm142_vm3 = vmand %vm141_vm2, %vm116_vm0  ;;  %v164_v14 = vsel %vm159_vm5, %v163_v13, 0.0  ;;  %v122_v39 = vsel %vm120_vm10, %v121_v38, 0.0  ;;  %vm210_vm11 = vcmp.eq.s32.totalorder %v578_v3, 10 }
  0x1f   : > { %v143_v8 = vsel %vm142_vm3, %v476_v6, 0.0  ;;  %139 = vadd.xlane.f32.xlu0 %v138_v7  ;;  %vm125_vm12 = vcmp.le.s32.totalorder %v580_v4, %v578_v3  ;;  %vm152_vm14 = vcmp.eq.s32.totalorder %v578_v3, %v580_v4  ;;  %vm220_vm15 = vcmp.eq.s32.totalorder %v578_v3, 9 }
  0x20   : > { %vm126_vm13 = vmand %vm125_vm12, %vm116_vm0  ;;  %v153_v50 = vsel %vm152_vm14, -1.0, %v540_v49  ;;  %vm240_vm0 = vcmp.eq.s32.totalorder %v578_v3, 7  ;;  %vm230_vm1 = vcmp.eq.s32.totalorder %v578_v3, 8  ;;  %vm254_vm2 = vcmp.eq.s32.totalorder %v578_v3, 6 }
  0x21   : > { %v127_v46 = vsel %vm126_vm13, %v121_v38, 0.0  ;;  %vm268_vm3 = vcmp.eq.s32.totalorder %v578_v3, 5  ;;  %vm282_vm4 = vcmp.eq.s32.totalorder %v578_v3, 4  ;;  %vm296_vm5 = vcmp.eq.s32.totalorder %v578_v3, 3 }
  0xac   : > { %v591_v9 = vpop.xlane.xlu0 %139 }
  0xad   : > { %511 = vrcp.f32 %v591_v9  ;;  %vm353_vm10 = vweird.f32 %v591_v9 }
  0xb7   : > { %v594_v10 = vpop.eup %511 }
  0xb8   : > { %v145_v11 = vmul.f32 %v594_v10, %v143_v8 }
  0xba   : > { %146 = vst [vmem:[#allocation2 + $0x8] sm:$0xff] %v145_v11 }
  0xc1   : > { %v166_v15 = vld [vmem:[#allocation2 + $0xe] ss:$0 sm:$0xff]  ;;  %v176_v18 = vld [vmem:[#allocation2 + $0xd] ss:$0 sm:$0xff]  ;;  %v186_v23 = vld [vmem:[#allocation2 + $0xc] ss:$0 sm:$0xff] }
  0xc2   : > { %v167_v16 = vxor.u32 2147483648, %v166_v15  ;;  %v177_v20 = vxor.u32 2147483648, %v176_v18  ;;  %v187_v25 = vxor.u32 2147483648, %v186_v23  ;;  %v196_v28 = vld [vmem:[#allocation2 + $0xb] ss:$0 sm:$0xff] }
  0xc3   : > { %v197_v30 = vxor.u32 2147483648, %v196_v28  ;;  %v206_v33 = vld [vmem:[#allocation2 + $0xa] ss:$0 sm:$0xff]  ;;  %v216_v40 = vld [vmem:[#allocation2 + $0x9] ss:$0 sm:$0xff] }
  0xc4   : > { %v171_v17 = vmul.f32 %v167_v16, %v164_v14  ;;  %v207_v35 = vxor.u32 2147483648, %v206_v33  ;;  %v217_v42 = vxor.u32 2147483648, %v216_v40  ;;  %v226_v54 = vld [vmem:[#allocation2 + $0x8] ss:$0 sm:$0xff] }
  0xc5   : > { %v227_v56 = vxor.u32 2147483648, %v226_v54 }
  0xc6   : > { %172 = vadd.xlane.f32.xlu0 %v171_v17 }
 0x153   : > { %v173_v19 = vpop.xlane.xlu0 %172 }
 0x154   : > { %v174_v21 = vsel %vm170_vm6, %v173_v19, %v164_v14  ;;  %vm310_vm6 = vcmp.eq.s32.totalorder %v578_v3, 2 }
 0x155   : > { %v181_v22 = vmul.f32 %v177_v20, %v174_v21 }
 0x157   : > { %182 = vadd.xlane.f32.xlu1 %v181_v22 }
 0x1e4   : > { %v183_v24 = vpop.xlane.xlu1 %182 }
 0x1e5   : > { %v184_v26 = vsel %vm180_vm7, %v183_v24, %v174_v21  ;;  %vm324_vm7 = vcmp.eq.s32.totalorder %v578_v3, 1 }
 0x1e6   : > { %v191_v27 = vmul.f32 %v187_v25, %v184_v26 }
 0x1e8   : > { %192 = vadd.xlane.f32.xlu1 %v191_v27 }
 0x275   : > { %v193_v29 = vpop.xlane.xlu1 %192 }
 0x276   : > { %v194_v31 = vsel %vm190_vm8, %v193_v29, %v184_v26  ;;  %vm337_vm8 = vcmp.eq.s32.totalorder %v578_v3, 0 }
 0x277   : > { %v201_v32 = vmul.f32 %v197_v30, %v194_v31 }
 0x279   : > { %202 = vadd.xlane.f32.xlu0 %v201_v32 }
 0x306   : > { %v203_v34 = vpop.xlane.xlu0 %202 }
 0x307   : > { %v204_v36 = vsel %vm200_vm9, %v203_v34, %v194_v31 }
 0x308   : > { %v211_v37 = vmul.f32 %v207_v35, %v204_v36 }
 0x30a   : > { %212 = vadd.xlane.f32.xlu1 %v211_v37 }
 0x30e   : > { %123 = vadd.xlane.f32.xlu1 %v122_v39 }
 0x397   : > { %v213_v41 = vpop.xlane.xlu1 %212 }
 0x398   : > { %v214_v43 = vsel %vm210_vm11, %v213_v41, %v204_v36 }
 0x399   : > { %v221_v44 = vmul.f32 %v217_v42, %v214_v43 }
 0x39b   : > { %222 = vadd.xlane.f32.xlu0 %v221_v44  ;;  %v607_v45 = vpop.xlane.xlu1 %123 }
 0x39c   : > { %513 = vrcp.f32 %v607_v45  ;;  %vm348_vm9 = vweird.f32 %v607_v45 }
 0x3a6   : > { %v614_v47 = vpop.eup %513 }
 0x3a7   : > { %v129_v48 = vmul.f32 %v614_v47, %v127_v46 }
 0x3a9   : > { %130 = vst [vmem:[#allocation2] sm:$0xff] %v129_v48 }
 0x3b0   : > { %v236_v51 = vld [vmem:[#allocation2 + $0x7] ss:$0 sm:$0xff]  ;;  %v250_v59 = vld [vmem:[#allocation2 + $0x6] ss:$0 sm:$0xff]  ;;  %v264_v4 = vld [vmem:[#allocation2 + $0x5] ss:$0 sm:$0xff] }
 0x3b1   : > { %v237_v52 = vxor.u32 2147483648, %v236_v51  ;;  %v251_v60 = vxor.u32 2147483648, %v250_v59  ;;  %v265_v6 = vxor.u32 2147483648, %v264_v4  ;;  %v278_v14 = vld [vmem:[#allocation2 + $0x4] ss:$0 sm:$0xff] }
 0x3b2   : > { %v279_v16 = vxor.u32 2147483648, %v278_v14  ;;  %v292_v22 = vld [vmem:[#allocation2 + $0x3] ss:$0 sm:$0xff]  ;;  %v306_v30 = vld [vmem:[#allocation2 + $0x2] ss:$0 sm:$0xff] }
 0x3b3   : > { %v241_v53 = vmul.f32 %v237_v52, %v153_v50  ;;  %v293_v24 = vxor.u32 2147483648, %v292_v22  ;;  %v307_v32 = vxor.u32 2147483648, %v306_v30  ;;  %v320_v38 = vld [vmem:[#allocation2 + $0x1] ss:$0 sm:$0xff]  ;;  %v333_v48 = vld [vmem:[#allocation2] ss:$0 sm:$0xff] }
 0x3b4   : > { %v321_v40 = vxor.u32 2147483648, %v320_v38 }
 0x3b5   : > { %242 = vadd.xlane.f32.xlu1 %v241_v53 }
 0x428   : > { %v223_v55 = vpop.xlane.xlu0 %222 }
 0x429   : > { %v224_v57 = vsel %vm220_vm15, %v223_v55, %v214_v43 }
 0x42a   : > { %v231_v58 = vmul.f32 %v227_v56, %v224_v57 }
 0x42c   : > { %232 = vadd.xlane.f32.xlu0 %v231_v58 }
 0x442   : > { %v243_v61 = vpop.xlane.xlu1 %242 }
 0x443   : > { %v244_v62 = vsel %vm240_vm0, %v243_v61, %v153_v50  ;;  %v334_v50 = vxor.u32 2147483648, %v333_v48 }
 0x444   : > { %v255_v63 = vmul.f32 %v251_v60, %v244_v62 }
 0x446   : > { %256 = vadd.xlane.f32.xlu1 %v255_v63 }
 0x4b9   : > { %v233_v0 = vpop.xlane.xlu0 %232 }
 0x4ba   : > { %v234_v1 = vsel %vm230_vm1, %v233_v0, %v224_v57 }
 0x4bb   : > { %v245_v2 = vmul.f32 %v237_v52, %v234_v1 }
 0x4bd   : > { %246 = vadd.xlane.f32.xlu0 %v245_v2 }
 0x4d3   : > { %v257_v5 = vpop.xlane.xlu1 %256 }
 0x4d4   : > { %v258_v7 = vsel %vm254_vm2, %v257_v5, %v244_v62 }
 0x4d5   : > { %v269_v8 = vmul.f32 %v265_v6, %v258_v7 }
 0x4d7   : > { %270 = vadd.xlane.f32.xlu1 %v269_v8 }
 0x54a   : > { %v247_v11 = vpop.xlane.xlu0 %246 }
 0x54b   : > { %v248_v12 = vsel %vm240_vm0, %v247_v11, %v234_v1 }
 0x54c   : > { %v259_v13 = vmul.f32 %v251_v60, %v248_v12 }
 0x54e   : > { %260 = vadd.xlane.f32.xlu0 %v259_v13 }
 0x564   : > { %v271_v15 = vpop.xlane.xlu1 %270 }
 0x565   : > { %v272_v17 = vsel %vm268_vm3, %v271_v15, %v258_v7 }
 0x566   : > { %v283_v18 = vmul.f32 %v279_v16, %v272_v17 }
 0x568   : > { %284 = vadd.xlane.f32.xlu1 %v283_v18 }
 0x5db   : > { %v261_v19 = vpop.xlane.xlu0 %260 }
 0x5dc   : > { %v262_v20 = vsel %vm254_vm2, %v261_v19, %v248_v12 }
 0x5dd   : > { %v273_v21 = vmul.f32 %v265_v6, %v262_v20 }
 0x5df   : > { %274 = vadd.xlane.f32.xlu0 %v273_v21 }
 0x5f5   : > { %v285_v23 = vpop.xlane.xlu1 %284 }
 0x5f6   : > { %v286_v25 = vsel %vm282_vm4, %v285_v23, %v272_v17 }
 0x5f7   : > { %v297_v26 = vmul.f32 %v293_v24, %v286_v25 }
 0x5f9   : > { %298 = vadd.xlane.f32.xlu1 %v297_v26 }
 0x66c   : > { %v275_v27 = vpop.xlane.xlu0 %274 }
 0x66d   : > { %v276_v28 = vsel %vm268_vm3, %v275_v27, %v262_v20 }
 0x66e   : > { %v287_v29 = vmul.f32 %v279_v16, %v276_v28 }
 0x670   : > { %288 = vadd.xlane.f32.xlu0 %v287_v29 }
 0x686   : > { %v299_v31 = vpop.xlane.xlu1 %298 }
 0x687   : > { %v300_v33 = vsel %vm296_vm5, %v299_v31, %v286_v25 }
 0x688   : > { %v311_v34 = vmul.f32 %v307_v32, %v300_v33 }
 0x68a   : > { %312 = vadd.xlane.f32.xlu1 %v311_v34 }
 0x6fd   : > { %v289_v35 = vpop.xlane.xlu0 %288 }
 0x6fe   : > { %v290_v36 = vsel %vm282_vm4, %v289_v35, %v276_v28 }
 0x6ff   : > { %v301_v37 = vmul.f32 %v293_v24, %v290_v36 }
 0x701   : > { %302 = vadd.xlane.f32.xlu0 %v301_v37 }
 0x717   : > { %v313_v39 = vpop.xlane.xlu1 %312 }
 0x718   : > { %v314_v41 = vsel %vm310_vm6, %v313_v39, %v300_v33 }
 0x719   : > { %v325_v42 = vmul.f32 %v321_v40, %v314_v41 }
 0x71b   : > { %326 = vadd.xlane.f32.xlu1 %v325_v42 }
 0x78e   : > { %v303_v43 = vpop.xlane.xlu0 %302 }
 0x78f   : > { %v304_v44 = vsel %vm296_vm5, %v303_v43, %v290_v36 }
 0x790   : > { %v315_v46 = vmul.f32 %v307_v32, %v304_v44 }
 0x792   : > { %316 = vadd.xlane.f32.xlu0 %v315_v46 }
 0x7a8   : > { %v327_v49 = vpop.xlane.xlu1 %326 }
 0x7a9   : > { %v328_v51 = vsel %vm324_vm7, %v327_v49, %v314_v41 }
 0x7aa   : > { %v338_v52 = vmul.f32 %v334_v50, %v328_v51 }
 0x7ac   : > { %339 = vadd.xlane.f32.xlu1 %v338_v52 }
 0x81f   : > { %v317_v53 = vpop.xlane.xlu0 %316 }
 0x820   : > { %v318_v54 = vsel %vm310_vm6, %v317_v53, %v304_v44 }
 0x821   : > { %v329_v55 = vmul.f32 %v321_v40, %v318_v54 }
 0x823   : > { %330 = vadd.xlane.f32.xlu0 %v329_v55 }
 0x839   : > { %v340_v56 = vpop.xlane.xlu1 %339 }
 0x83a   : > { %v341_v57 = vsel %vm337_vm8, %v340_v56, %v328_v51 }
 0x83b   : > { %v347_v58 = vmul.f32 %v614_v47, %v341_v57 }
 0x83d   : > { %v349_v59 = vsel %vm348_vm9, %v341_v57, %v347_v58 }
 0x83e   : > { %398 = vst [vmem:[%s367_s24] sm:$0xff] %v349_v59 }
 0x8b0   : > { %v331_v60 = vpop.xlane.xlu0 %330 }
 0x8b1   : > { %v332_v61 = vsel %vm324_vm7, %v331_v60, %v318_v54 }
 0x8b2   : > { %v342_v62 = vmul.f32 %v334_v50, %v332_v61 }
 0x8b4   : > { %343 = vadd.xlane.f32.xlu0 %v342_v62 }
 0x941   : > { %v344_v63 = vpop.xlane.xlu0 %343 }
 0x942   : > { %v345_v0 = vsel %vm337_vm8, %v344_v63, %v332_v61 }
 0x943   : > { %v352_v1 = vmul.f32 %v594_v10, %v345_v0 }
 0x945   : > { %v354_v2 = vsel %vm353_vm10, %v345_v0, %v352_v1 }
 0x946   : > { %400 = vst [vmem:[%s367_s24 + $0x8] sm:$0xff] %v354_v2 }
 0x947 PF: > { %s7_s8 = sadd.s32 1, %s537_s8   ;;  %s676_s6 = smov %s533_s7 }
 0x948   : > { %p4_p5 = scmp.ge.s32.totalorder %s7_s8, 4   ;;  %s677_s7 = smov %s679_s10 }
 0x94a   :  { %6 = sbr.rel (!%p4_p5) target bundleno = 2 (0x2), region = 135 }

// kernel: jvp__.3
= control target key start
LH: loop header
LB: loop body
LE: loop exit
PB: predicated region body
PF: predicated region fallthrough
CT: control target
= control target key end

     0   :  { %s1209_s15 = smov 0   ;;  %s1301_s0 = inlined_call_operand.vmem [shape: f32[2,32,16], index: 0, kind: input, shape index: {}]   ;;  %s1302_s1 = inlined_call_operand.vmem [shape: f32[2,32,32], index: 1, kind: input, shape index: {}]   ;;  %s1303_s2 = inlined_call_operand.vmem [shape: f32[2,4,2], index: 2, kind: input, shape index: {}]   ;;  %s1304_s3 = inlined_call_operand.vmem [shape: f32[2,88,32], index: 3, kind: input, shape index: {}]   ;;  %s1305_s4 = inlined_call_operand.vmem [shape: f32[2,32,32], index: 4, kind: output, shape index: {}]  }
   0x1 LB: > { %s1002_s16 = sadd.s32 4294967295, %s1175_s15   ;;  %p1006_p0 = scmp.ge.s32.totalorder %s1175_s15, 1  ;;  %s1175_s15 = sphi %s1209_s15, %s14_s15  }
   0x2   : > { %p191_p1 = scmp.lt.s32.totalorder %s1175_s15, 3 }
   0x4   : > { %p192_p2 = pnand %p1006_p0, %p191_p1 }
   0x5   : > { %p231_p3 = scmp.lt.s32.totalorder (!%p192_p2), %s1002_s16, 1  ;;  %vm275_vm0 = vcmask (!%p192_p2), 130048   ;;  %vm377_vm1 = vcmask (!%p192_p2), 261120   ;;  %v1177_v20 = vmov (!%p192_p2), 0.0|0.0   ;;  %vm1178_vm2 = vmmov (!%p192_p2), 0   ;;  %s1180_s6 = smov (!%p192_p2), 127  }
   0x6   : > { %195 = sbr.rel (%p192_p2) target bundleno = 1409 (0x581), region = 36  ;;  %v1179_v24 = vmov (!%p192_p2), 0.0   ;;  %v373_v29 = vlaneseq (!%p192_p2)  ;;  %vm519_vm3 = vcmask (!%p192_p2), 1041409   ;;  %vm521_vm4 = vcmask (!%p192_p2), 1042434   ;;  %s1183_s9 = smov (!%p192_p2), 16  }
   0x7   : > { %vm523_vm5 = vcmask (!%p192_p2), 1043459   ;;  %vm675_vm6 = vcmask (!%p192_p2), 3072   ;;  %vm692_vm7 = vcmask (!%p192_p2), 125952   ;;  %vm818_vm8 = vcmask (!%p192_p2), 1043456  }
   0x8   : > { %v1262_v30 = vshrl.u32 (!%p192_p2), %v373_v29, 7  ;;  %vm805_vm9 = vcmask (!%p192_p2), 31744  }
   0xa   : > { %v375_v31 = vsub.s32 (!%p192_p2), 0, %v1262_v30 }
   0xd   : > { %s1307_s16 = smov (!%p231_p3, %s1002_s16), 1 }
   0xe   : > { %s1142_s17 = smul.u32 88, %s1307_s16  ;;  %s1221_s18 = sshll.u32 %s1307_s16, 5 }
   0xf   : > { %s235_s21 = scalar_lea.vmem %s1301_s0, %s1221_s18  ;;  %s240_s27 = scalar_lea.vmem %s1302_s1, %s1221_s18 }
  0x10   : > { %s1230_s24 = scalar_lea.vmem %s1304_s3, %s1142_s17  ;;  %v255_v0 = vld [vmem:[%s235_s21] sm:$0xff]  ;;  %v256_v4 = vld [vmem:[%s235_s21 + $0x8] sm:$0xff]  ;;  %v257_v5 = vld [vmem:[%s235_s21 + $0x10] sm:$0xff]  ;;  %s1011_s28 = sshll.u32 %s1307_s16, 2 }
  0x11   : > { %v264_v1 = vld [vmem:[%s1230_s24] sm:$0xff]  ;;  %v265_v2 = vld [vmem:[%s1230_s24 + $0x8] sm:$0xff]  ;;  %1068 = vmatprep.mubr.msk.f32.mxu0 %vm275_vm0, %v255_v0  ;;  %v258_v6 = vld [vmem:[%s235_s21 + $0x18] sm:$0xff]  ;;  %s244_s5 = scalar_lea.vmem %s1303_s2, %s1011_s28  ;;  %s254_s12 = scalar_lea.vmem %s1305_s4, %s1221_s18 }
  0x12   : > { %v1118_v3 = vpack.c.bf16 %v265_v2, %v264_v1  ;;  %v259_v7 = vld [vmem:[%s240_s27] sm:$0xff]  ;;  %v260_v14 = vld [vmem:[%s240_s27 + $0x8] sm:$0xff]  ;;  %v261_v15 = vld [vmem:[%s240_s27 + $0x10] sm:$0xff] }
  0x13   : > { %1082 = vmatprep.mubr.msk.f32.mxu1 %vm377_vm1, %v259_v7  ;;  %v262_v16 = vld [vmem:[%s240_s27 + $0x18] sm:$0xff]  ;;  %v266_v17 = vld [vmem:[%s1230_s24 + $0x10] sm:$0xff]  ;;  %v268_v21 = vld [vmem:[%s1230_s24 + $0x20] sm:$0xff] }
  0x14   : > { %1119 = vmatprep.subr.bf16.mxu0 %v1118_v3  ;;  %v267_v18 = vld [vmem:[%s1230_s24 + $0x18] sm:$0xff]  ;;  %v269_v22 = vld [vmem:[%s1230_s24 + $0x28] sm:$0xff]  ;;  %v270_v25 = vld [vmem:[%s1230_s24 + $0x30] sm:$0xff] }
  0x15   : > { %1121 = vmatpush3.bf16.msra.mxu0 %v1118_v3  ;;  %v1131_v19 = vpack.c.bf16 %v267_v18, %v266_v17  ;;  %v1134_v23 = vpack.c.bf16 %v269_v22, %v268_v21  ;;  %v271_v26 = vld [vmem:[%s1230_s24 + $0x38] sm:$0xff]  ;;  %v1258_v28 = vld [vmem:[%s244_s5] sm:$0xf]  ;;  %v1266_v32 = vld [vmem:[%s1230_s24 + $0x50] sm:$0xff] }
  0x16   : > { %1130 = vmatprep.subr.bf16.mxu0 %v1177_v20  ;;  %v1137_v27 = vpack.c.bf16 %v271_v26, %v270_v25  ;;  %705 = vrot.lane.b32.xlu0 %v1258_v28, %s1180_s6  ;;  %v376_v33 = vrot.slane %v1266_v32, %v375_v31  ;;  %v272_v17 = vld [vmem:[%s1230_s24 + $0x40] sm:$0xff]  ;;  %v273_v18 = vld [vmem:[%s1230_s24 + $0x48] sm:$0xff]  ;;  %v676_v22 = vsel %vm675_vm6, %v1258_v28, 0.0  ;;  %v1182_v25 = vmov 1  }
  0x17   : > { %1164 = vset.pattern.permute.xlu0 %v1182_v25  ;;  %v513_v26 = vsub.s32 1, %v1262_v30 }
  0x18   : > { %1069 = vmatmul.mubr.msk.f32.vlgmr.msra.gmra.mrb[0].mxu0 %vm275_vm0, %v256_v4 }
  0x19   : > { %1071 = vmatprep.mubr.msk.f32.mxu0 %vm275_vm0, %v257_v5  ;;  %1132 = vmatpush3.bf16.msra.mxu0 %v1131_v19  ;;  %v1140_v19 = vpack.c.bf16 %v273_v18, %v272_v17 }
  0x1a   : > { %1133 = vmatprep.subr.bf16.mxu0 %v1177_v20 }
  0x1c   : > { %1072 = vmatmul.mubr.msk.f32.gmra.mrb[2].mxu0 %vm275_vm0, %v258_v6 }
  0x1d   : > { %1135 = vmatpush3.bf16.msra.mxu0 %v1134_v23  ;;  %1096 = vmatprep.mubr.msk.f32.mxu0 %vm1178_vm2, %v1179_v24  ;;  %v1181_v23 = vmov 0  }
  0x1e   : > { %1162 = vset.pattern.permute.xlu1 %v1181_v23 }
  0x35   : > { %677 = vadd.xlane.f32.xlu0 %v676_v22 }
  0xeb   : > { %v1070_v8 = vpop.f32.mrb[0].mxu0 }
  0xec   : > { %v354_v9 = vpop.f32.mrb[1].mxu0 }
  0xed   : > { %v1122_v10 = vpack.c.bf16 %v1070_v8, %v354_v9 }
  0xef   : > { %v1073_v11 = vpop.f32.mrb[2].mxu0  ;;  %1123 = vmatprep.subr.bf16.mxu1 %v1122_v10 }
  0xf0   : > { %v364_v12 = vpop.f32.mrb[3].mxu0  ;;  %1125 = vmatpush3.bf16.msra.mxu1 %v1122_v10 }
  0xf1   : > { %v1126_v13 = vpack.c.bf16 %v1073_v11, %v364_v12 }
  0xf3   : > { %1127 = vmatprep.subr.bf16.mxu1 %v1126_v13 }
  0xf4   : > { %1129 = vmatpush3.bf16.msra.mxu1 %v1126_v13 }
  0xf5   : > { %1136 = vmatprep.subr.bf16.mxu1 %v1177_v20 }
  0xf7   : > { %1083 = vmatmul.mubr.msk.f32.vlgmr.msra.gmra.mrb[0].mxu1 %vm377_vm1, %v260_v14 }
  0xf8   : > { %1085 = vmatprep.mubr.msk.f32.mxu1 %vm377_vm1, %v261_v15  ;;  %1138 = vmatpush3.bf16.msra.mxu1 %v1137_v27  ;;  %v514_v27 = vrot.slane %v1266_v32, %v513_v26 }
  0xf9   : > { %1139 = vmatprep.subr.bf16.mxu1 %v1177_v20  ;;  %v706_v20 = vpop.permute.xlu0 %705 }
  0xfa   : > { %v708_v21 = vsel %vm675_vm6, %v706_v20, 0.0 }
  0xfb   : > { %1086 = vmatmul.mubr.msk.f32.gmra.mrb[2].mxu1 %vm377_vm1, %v262_v16  ;;  %709 = vadd.xlane.f32.xlu1 %v708_v21 }
  0xfc   : > { %1107 = vmatprep.mubr.msk.f32.mxu1 %vm1178_vm2, %v1179_v24  ;;  %1141 = vmatpush3.bf16.msra.mxu1 %v1140_v19 }
 0x10c   : > { %688 = vperm.xlu1 %1162, %v1258_v28  }
 0x110   : > { %1163 = vset.pattern.permute.xlu1 %v1182_v25 }
 0x111   : > { %719 = vperm.xlu1 %1163, %v1258_v28  }
 0x1ca   : > { %v1084_v34 = vpop.f32.mrb[0].mxu1 }
 0x1cb   : > { %v462_v35 = vadd.f32 %v1084_v34, %v376_v33  ;;  %v456_v36 = vpop.f32.mrb[1].mxu1 }
 0x1cc   : > { %v457_v37 = vadd.f32 %v456_v36, %v376_v33  ;;  %v710_v36 = vpop.xlane.xlu1 %709 }
 0x1cd   : > { %v476_v38 = vmax.f32 %v462_v35, 0.0 }
 0x1ce   : > { %v475_v39 = vmax.f32 %v457_v37, 0.0  ;;  %v1087_v40 = vpop.f32.mrb[2].mxu1  ;;  %v678_v37 = vpop.xlane.xlu0 %677 }
 0x1cf   : > { %v486_v41 = vsel %vm377_vm1, %v476_v38, 0.0  ;;  %v472_v42 = vadd.f32 %v1087_v40, %v376_v33  ;;  %v466_v43 = vpop.f32.mrb[3].mxu1  ;;  %v711_v38 = vrot.slane %v710_v36, 4 }
 0x1d0   : > { %v487_v44 = vrot.slane %v486_v41, 4  ;;  %v479_v45 = vsel %vm377_vm1, %v475_v39, 0.0  ;;  %v467_v46 = vadd.f32 %v466_v43, %v376_v33  ;;  %v679_v39 = vrot.slane %v678_v37, 4 }
 0x1d1   : > { %v480_v47 = vrot.slane %v479_v45, 4  ;;  %v478_v48 = vmax.f32 %v472_v42, 0.0  ;;  %v712_v40 = vadd.f32 %v711_v38, %v710_v36  ;;  %v756_v38 = vand.u32 127, %v373_v29 }
 0x1d2   : > { %v488_v49 = vadd.f32 %v487_v44, %v486_v41  ;;  %v477_v50 = vmax.f32 %v467_v46, 0.0  ;;  %v680_v41 = vadd.f32 %v679_v39, %v678_v37  ;;  %v752_v37 = vadd.s32 8, %v1262_v30 }
 0x1d3   : > { %v481_v51 = vadd.f32 %v480_v47, %v479_v45  ;;  %v500_v52 = vsel %vm377_vm1, %v478_v48, 0.0  ;;  %v713_v42 = vrot.slane %v712_v40, 2  ;;  %vm757_vm11 = vcmp.eq.s32.totalorder %v1262_v30, %v756_v38 }
 0x1d4   : > { %v489_v53 = vrot.slane %v488_v49, 2  ;;  %v501_v54 = vrot.slane %v500_v52, 4  ;;  %v493_v55 = vsel %vm377_vm1, %v477_v50, 0.0  ;;  %v681_v43 = vrot.slane %v680_v41, 2  ;;  %v689_v50 = vpop.permute.xlu1 %688 }
 0x1d5   : > { %v482_v56 = vrot.slane %v481_v51, 2  ;;  %v494_v57 = vrot.slane %v493_v55, 4  ;;  %v714_v28 = vadd.f32 %v713_v42, %v712_v40  ;;  %vm758_vm10 = vcmp.eq.s32.totalorder %v752_v37, %v756_v38 }
 0x1d6   : > { %v490_v58 = vadd.f32 %v489_v53, %v488_v49  ;;  %v502_v59 = vadd.f32 %v501_v54, %v500_v52  ;;  %v682_v44 = vadd.f32 %v681_v43, %v680_v41  ;;  %v600_v49 = vsub.s32 2, %v1262_v30 }
 0x1d7   : > { %v483_v60 = vadd.f32 %v482_v56, %v481_v51  ;;  %v495_v61 = vadd.f32 %v494_v57, %v493_v55  ;;  %v715_v46 = vrot.slane %v714_v28, 1  ;;  %v770_v39 = vsel %vm758_vm10, 0.0001, %v1179_v24 }
 0x1d8   : > { %v491_v62 = vrot.slane %v490_v58, 1  ;;  %v503_v63 = vrot.slane %v502_v59, 2  ;;  %v683_v45 = vrot.slane %v682_v44, 1  ;;  %v601_v51 = vrot.slane %v1266_v32, %v600_v49  ;;  %v720_v53 = vpop.permute.xlu1 %719 }
 0x1d9   : > { %v484_v0 = vrot.slane %v483_v60, 1  ;;  %v496_v1 = vrot.slane %v495_v61, 2  ;;  %v716_v48 = vadd.f32 %v715_v46, %v714_v28  ;;  %v769_v40 = vsel %vm757_vm11, 0.0001, %v1179_v24 }
 0x1da   : > { %v492_v2 = vadd.f32 %v491_v62, %v490_v58  ;;  %v504_v3 = vadd.f32 %v503_v63, %v502_v59  ;;  %v684_v47 = vadd.f32 %v683_v45, %v682_v44 }
 0x1db   : > { %v485_v4 = vadd.f32 %v484_v0, %v483_v60  ;;  %v497_v5 = vadd.f32 %v496_v1, %v495_v61 }
 0x1dc   : > { %v508_v6 = vmul.f32 0.125, %v492_v2  ;;  %v505_v7 = vrot.slane %v504_v3, 1  ;;  %1143 = vpush %v684_v47 }
 0x1dd   : > { %v507_v8 = vmul.f32 0.125, %v485_v4  ;;  %v498_v9 = vrot.slane %v497_v5, 1  ;;  %1145 = vpush %v716_v48 }
 0x1de   : > { %v506_v10 = vadd.f32 %v505_v7, %v504_v3 }
 0x1df   : > { %v499_v11 = vadd.f32 %v498_v9, %v497_v5  ;;  %v520_v12 = vsel %vm519_vm3, %v508_v6, %v507_v8 }
 0x1e0   : > { %v510_v14 = vmul.f32 0.125, %v506_v10 }
 0x1e1   : > { %v509_v13 = vmul.f32 0.125, %v499_v11 }
 0x1e3   : > { %v522_v15 = vsel %vm521_vm4, %v509_v13, %v520_v12 }
 0x1e4   : > { %v524_v16 = vsel %vm523_vm5, %v510_v14, %v522_v15 }
 0x1e5   : > { %1097 = vmatmul.mubr.msk.f32.vlgmr.msra.gmra.mrb[4].mxu0 %vm377_vm1, %v524_v16 }
 0x20d   : > { %s1144_s7 = spop %1143 }
 0x20e   : > { %s1146_s8 = spop %1145  ;;  %v700_v56 = vstv %s1144_s7 }
 0x20f   : > { %v730_v60 = vstv %s1146_s8  ;;  %1165 = vrcp.f32 %v700_v56 }
 0x210   : > { %1167 = vrcp.f32 %v730_v60 }
 0x219   : > { %v1166_v13 = vpop.eup %1165 }
 0x21a   : > { %v1168_v16 = vpop.eup %1167 }
 0x2b8   : > { %v593_v31 = vpop.f32.mrb[4].mxu0 }
 0x2b9   : > { %v594_v33 = vadd.f32 %v593_v31, %v514_v27  ;;  %v1098_v34 = vpop.f32.mrb[5].mxu0 }
 0x2bb   : > { %v597_v35 = vmax.f32 %v594_v33, 0.0 }
 0x2bd   : > { %1108 = vmatmul.mubr.msk.f32.vlgmr.msra.gmra.mrb[4].mxu1 %vm377_vm1, %v597_v35 }
 0x390   : > { %v671_v52 = vpop.f32.mrb[4].mxu1 }
 0x391   : > { %v672_v54 = vadd.f32 %v671_v52, %v601_v51  ;;  %v1109_v55 = vpop.f32.mrb[5].mxu1 }
 0x393   : > { %v691_v57 = vmul.f32 %v689_v50, %v672_v54  ;;  %v722_v58 = vmul.f32 %v720_v53, %v672_v54  ;;  %v735_v59 = vsel %vm692_vm7, %v672_v54, 0.0 }
 0x394   : > { %v736_v61 = vrot.slane %v735_v59, 4 }
 0x395   : > { %v693_v62 = vsel %vm692_vm7, %v691_v57, 0.0  ;;  %v723_v63 = vsel %vm692_vm7, %v722_v58, 0.0 }
 0x396   : > { %v694_v0 = vrot.slane %v693_v62, 4  ;;  %v724_v1 = vrot.slane %v723_v63, 4  ;;  %v737_v2 = vadd.f32 %v736_v61, %v735_v59 }
 0x398   : > { %v695_v32 = vadd.f32 %v694_v0, %v693_v62  ;;  %v725_v3 = vadd.f32 %v724_v1, %v723_v63  ;;  %v738_v4 = vrot.slane %v737_v2, 2 }
 0x39a   : > { %v696_v5 = vrot.slane %v695_v32, 2  ;;  %v726_v6 = vrot.slane %v725_v3, 2  ;;  %v739_v7 = vadd.f32 %v738_v4, %v737_v2 }
 0x39c   : > { %v697_v8 = vadd.f32 %v696_v5, %v695_v32  ;;  %v727_v9 = vadd.f32 %v726_v6, %v725_v3  ;;  %v740_v12 = vrot.slane %v739_v7, 1 }
 0x39e   : > { %v698_v10 = vrot.slane %v697_v8, 1  ;;  %v728_v11 = vrot.slane %v727_v9, 1  ;;  %v741_v19 = vadd.f32 %v740_v12, %v739_v7 }
 0x3a0   : > { %v699_v14 = vadd.f32 %v698_v10, %v697_v8  ;;  %v729_v15 = vadd.f32 %v728_v11, %v727_v9  ;;  %v742_v23 = vmul.f32 0.25, %v741_v19 }
 0x3a2   : > { %v702_v17 = vmul.f32 %v1166_v13, %v699_v14  ;;  %v732_v18 = vmul.f32 %v1168_v16, %v729_v15 }
 0x3a4   : > { %v703_v20 = vmul.f32 %v702_v17, %v689_v50  ;;  %v733_v21 = vmul.f32 %v732_v18, %v720_v53 }
 0x3a6   : > { %v734_v22 = vadd.f32 %v733_v21, %v703_v20 }
 0x3a8   : > { %v743_v25 = vsub.f32 %v672_v54, %v734_v22  ;;  %v744_v26 = vsub.f32 %v734_v22, %v742_v23 }
 0x3aa   : > { %746 = vrot.lane.b32.xlu1 %v744_v26, %s1183_s9 }
 0x41c   : > { %v747_v27 = vpop.permute.xlu1 %746 }
 0x41d   : > { %v749_v31 = vsel %vm275_vm0, %v743_v25, %v747_v27 }
 0x41e   : > { %773 = vxpose.xlu1.b32.start.end [1/1] (short) (narrow) %v749_v31, 32  ;;  %1110 = vmatprep.subr.msk.mxu0 %vm818_vm8, %v749_v31 }
 0x41f   : > { %1111 = vmatpush3.msk.msra.mxu0 %vm818_vm8, %v749_v31 }
 0x49e   : > { %v789_v33 = vpop.trf.xlu1 }
 0x49f   : > { %1112 = vmatprep.mubr.msk.f32.mxu0 %vm805_vm9, %v789_v33 }
 0x4a2   : > { %v790_v34 = vpop.trf.xlu1 }
 0x4a3   : > { %1113 = vmatmul.mubr.msk.f32.vlgmr.msra.gmra.mrb[6].mxu0 %vm805_vm9, %v790_v34 }
 0x4a6   : > { %v791_v35 = vpop.trf.xlu1 }
 0x4a7   : > { %1115 = vmatprep.mubr.msk.f32.mxu0 %vm805_vm9, %v791_v35 }
 0x4aa   : > { %v792_v36 = vpop.trf.xlu1 }
 0x4ab   : > { %1116 = vmatmul.mubr.msk.f32.gmra.mrb[8].mxu0 %vm805_vm9, %v792_v36 }
 0x576   : > { %v1114_v41 = vpop.f32.mrb[6].mxu0 }
 0x577   : > { %v894_v42 = vadd.f32 %v1114_v41, %v770_v39  ;;  %v888_v43 = vpop.f32.mrb[7].mxu0 }
 0x578   : > { %v889_v44 = vadd.f32 %v888_v43, %v769_v40 }
 0x579   : > { %908 = vst.msk [vmem:[%s254_s12 + $0x8] sm:$0xff] %vm377_vm1, %v894_v42 }
 0x57a   : > { %907 = vst.msk [vmem:[%s254_s12] sm:$0xff] %vm377_vm1, %v889_v44 }
 0x57e   : > { %v1117_v29 = vpop.f32.mrb[8].mxu0 }
 0x57f   : > { %910 = vst.msk [vmem:[%s254_s12 + $0x18] sm:$0xff] %vm377_vm1, %v1117_v29  ;;  %v898_v30 = vpop.f32.mrb[9].mxu0 }
 0x580   : > { %909 = vst.msk [vmem:[%s254_s12 + $0x10] sm:$0xff] %vm377_vm1, %v898_v30 }
 0x581 PF: > { %s14_s15 = sadd.s32 1, %s1175_s15  }
 0x582   : > { %p11_p4 = scmp.ge.s32.totalorder %s14_s15, 4  }
 0x584   :  { %13 = sbr.rel (!%p11_p4) target bundleno = 1 (0x1), region = 75 }

// kernel: sub.105
= control target key start
LH: loop header
LB: loop body
LE: loop exit
PB: predicated region body
PF: predicated region fallthrough
CT: control target
= control target key end

     0   :  { %s56_s0 = inlined_call_operand.vmem [shape: f32[2,1,16], index: 0, kind: input, shape index: {}]   ;;  %s57_s1 = inlined_call_operand.vmem [shape: f32[2,1,16], index: 1, kind: input, shape index: {}]   ;;  %s58_s2 = inlined_call_operand.vmem [shape: f32[2,1,16], index: 2, kind: output, shape index: {}]  }
   0x1   :  { %v3_v0 = vld [vmem:[%s56_s0] sm:$0x1]  ;;  %v20_v2 = vld [vmem:[%s56_s0 + $0x1] sm:$0x1] }
   0x2   :  { %v4_v1 = vld [vmem:[%s57_s1] sm:$0x1]  ;;  %v21_v4 = vld [vmem:[%s57_s1 + $0x1] sm:$0x1] }
   0x3   :  { %v7_v3 = vsub.f32 %v3_v0, %v4_v1  ;;  %v16_v5 = vsub.f32 %v20_v2, %v21_v4 }
   0x5   :  { %9 = vst [vmem:[%s58_s2] sm:$0x1] %v7_v3  ;;  %22 = vst [vmem:[%s58_s2 + $0x1] sm:$0x1] %v16_v5 }

</bundles_post_ra>
